<compile_context>
chip_gen: v5e
topology: v5e:2x2
jax: 0.10.0
libtpu: 0.0.40
codegen_flags: <defaults>
</compile_context>

<pallas_src>
import functools

import jax
import jax.numpy as jnp
from jax.experimental import pallas as pl
from jax.experimental.pallas import tpu as pltpu


def _sablock_kernel(x_ref, wqkv_ref, wout_ref, bout_ref, o_ref,
                    *, num_heads, head_dim):
    # x_ref:    (C, N)    this batch element, feature-major (leading dim squeezed)
    # wqkv_ref: (3C, C)   qkv weight (torch layout), q rows pre-scaled by 1/sqrt(d)
    # wout_ref: (C, C)    out_proj weight (torch layout: out, in)
    # bout_ref: (C, 1)    out_proj bias as a column
    # o_ref:    (C, N)
    x = x_ref[...]                                           # (C, N)
    wqkv = wqkv_ref[...]                                     # (3C, C)
    wout = wout_ref[...]                                     # (C, C)
    bout = bout_ref[...]                                     # (C, 1)

    C = num_heads * head_dim

    # qkv^T = Wqkv @ x  -> (3C, N); rows ordered (qkv_index, head, head_dim),
    # matching Rearrange('b h (qkv l d) -> qkv b l h d').
    qkv = jnp.dot(wqkv, x, preferred_element_type=jnp.float32)   # (3C, N)

    head_outs = []
    for h in range(num_heads):            # static unrolled loop over heads
        # sublane slices (head_dim = multiple of 8 -> aligned, no relayout)
        q = qkv[0 * C + h * head_dim:0 * C + (h + 1) * head_dim, :]   # (d, N)
        k = qkv[1 * C + h * head_dim:1 * C + (h + 1) * head_dim, :]   # (d, N)
        v = qkv[2 * C + h * head_dim:2 * C + (h + 1) * head_dim, :]   # (d, N)

        # s[x, y] = sum_d q[d, x] * k[d, y]  (scale already folded into Wq rows;
        # dot_general contracts head_dim directly -> no materialized k.T)
        s = jax.lax.dot_general(q, k, (((0,), (0,)), ((), ())),
                                preferred_element_type=jnp.float32)   # (N, N)

        # row-wise softmax (EUP exp + approx reciprocal -> off the VPU)
        m = jnp.max(s, axis=-1, keepdims=True)
        e = jnp.exp(s - m)
        p = e * pl.reciprocal(jnp.sum(e, axis=-1, keepdims=True), approx=True)

        # o^T[d, x] = sum_y v[d, y] * p[x, y]
        head_outs.append(
            jax.lax.dot_general(v, p, (((1,), (1,)), ((), ())),
                                preferred_element_type=jnp.float32))  # (d, N)

    # heads stack along the sublane axis -> (C, N); cheap aligned concat
    attn_t = head_outs[0] if num_heads == 1 else jnp.concatenate(head_outs, axis=0)

    # output projection in transposed layout: y^T = Wout @ attn^T + b
    y = jnp.dot(wout, attn_t, preferred_element_type=jnp.float32) + bout   # (C, N)
    o_ref[...] = y.astype(o_ref.dtype)


def sablock_forward(x_nchw, wqkv, wout, bout, *, num_heads):
    """x_nchw: (B, C, X, Y) NCHW, C == hidden_size.
       wqkv: (3C, C) torch Linear weight; wout: (C, C); bout: (C,)."""
    B, C, X, Y = x_nchw.shape
    N = X * Y
    head_dim = C // num_heads
    scale = float(head_dim) ** -0.5

    # Feature-major: (B, C, N) straight from NCHW -- no transpose passes.
    x_cn = x_nchw.reshape(B, C, N)

    # Fold the attention scale into the q rows of the qkv weight (trace time).
    q_scale = jnp.concatenate([jnp.full((C,), scale, dtype=wqkv.dtype),
                               jnp.ones((2 * C,), dtype=wqkv.dtype)])
    wqkv_scaled = wqkv * q_scale[:, None]                    # (3C, C)
    bout_col = bout.reshape(C, 1)

    kernel = functools.partial(_sablock_kernel,
                               num_heads=num_heads,
                               head_dim=head_dim)

    # TODO(synk): for large N, tile the KV axis with a flash-style online
    # softmax instead of materializing the (N, N) score matrix per head.
    out_cn = pl.pallas_call(
        kernel,
        out_shape=jax.ShapeDtypeStruct((B, C, N), x_cn.dtype),
        grid_spec=pltpu.PrefetchScalarGridSpec(
            num_scalar_prefetch=0,
            grid=(B,),
            in_specs=[
                pl.BlockSpec((pl.Squeezed(), C, N), lambda b: (b, 0, 0)),
                pl.BlockSpec((3 * C, C), lambda b: (0, 0)),
                pl.BlockSpec((C, C), lambda b: (0, 0)),
                pl.BlockSpec((C, 1), lambda b: (0, 0)),
            ],
            out_specs=pl.BlockSpec((pl.Squeezed(), C, N), lambda b: (b, 0, 0)),
        ),
        compiler_params=pltpu.CompilerParams(
            dimension_semantics=("parallel",)),   # batch axis shards across TCs (v7x)
    )(x_cn, wqkv_scaled, wout, bout_col)

    # (B, C, N) -> (B, C, X, Y): pure reshape, no data movement.
    return out_cn.reshape(B, C, X, Y)


def sablock_reference(x_nchw, wqkv, wout, bout, *, num_heads):
    """Plain-JAX reference mirroring the PyTorch forward exactly."""
    B, C, X, Y = x_nchw.shape
    N = X * Y
    head_dim = C // num_heads
    scale = float(head_dim) ** -0.5
    x = jnp.transpose(x_nchw, (0, 2, 3, 1)).reshape(B, N, C)
    qkv = x @ wqkv.T                                           # (B, N, 3C)
    qkv = qkv.reshape(B, N, 3, num_heads, head_dim)
    qkv = jnp.transpose(qkv, (2, 0, 3, 1, 4))                  # (3, B, H, N, d)
    q, k, v = qkv[0], qkv[1], qkv[2]
    att = jax.nn.softmax(jnp.einsum("blxd,blyd->blxy", q, k) * scale, axis=-1)
    o = jnp.einsum("bhxy,bhyd->bhxd", att, v)                  # (B, H, N, d)
    o = jnp.transpose(o, (0, 2, 1, 3)).reshape(B, N, C)
    o = o @ wout.T + bout
    return jnp.transpose(o.reshape(B, X, Y, C), (0, 3, 1, 2))


if __name__ == "__main__":
    # spatial_dims=2, hidden_size=32, num_heads=2, dropout=0, qkv_bias=False
    B, C, X, Y = 2, 32, 16, 16
    num_heads = 2

    key = jax.random.PRNGKey(0)
    kx, kqkv, kw, kb = jax.random.split(key, 4)
    x = jax.random.normal(kx, (B, C, X, Y), dtype=jnp.float32)
    # Deterministic synthetic parameters (torch Linear shapes: (out, in)).
    wqkv = jax.random.normal(kqkv, (3 * C, C), dtype=jnp.float32) * (1.0 / C ** 0.5)
    wout = jax.random.normal(kw, (C, C), dtype=jnp.float32) * (1.0 / C ** 0.5)
    bout = jax.random.normal(kb, (C,), dtype=jnp.float32) * 0.01

    out = sablock_forward(x, wqkv, wout, bout, num_heads=num_heads)
    out = jax.block_until_ready(out)

    ref = sablock_reference(x, wqkv, wout, bout, num_heads=num_heads)
    assert out.shape == (B, C, X, Y)
    # Tolerance slightly relaxed vs exact f32: approx (EUP) softmax reciprocal.
    assert jnp.allclose(out, ref, atol=2e-3, rtol=2e-3), "mismatch vs reference"

    print("KERNEL_OK")
</pallas_src>

<mosaic_0001>
module attributes {stable_mosaic.version = 11 : i64} {
  func.func @_sablock_kernel(%arg0: i32, %arg1: memref<1x32x256xf32, #tpu.memory_space<vmem>>, %arg2: memref<96x32xf32, #tpu.memory_space<vmem>>, %arg3: memref<32x32xf32, #tpu.memory_space<vmem>>, %arg4: memref<32x1xf32, #tpu.memory_space<vmem>>, %arg5: memref<1x32x256xf32, #tpu.memory_space<vmem>>) attributes {dimension_semantics = [#tpu.dimension_semantics<parallel>], iteration_bounds = array<i64: 2>, scalar_prefetch = 0 : i64, scratch_operands = 0 : i64, tpu.core_type = #tpu.core_type<tc>, window_params = [{transform_indices = @transform_0, window_bounds = array<i64: 1, 32, 256>}, {pipeline_mode = #tpu.pipeline_mode<synchronous>, transform_indices = @transform_1, window_bounds = array<i64: 96, 32>}, {pipeline_mode = #tpu.pipeline_mode<synchronous>, transform_indices = @transform_2, window_bounds = array<i64: 32, 32>}, {pipeline_mode = #tpu.pipeline_mode<synchronous>, transform_indices = @transform_3, window_bounds = array<i64: 32, 1>}, {transform_indices = @transform_4, window_bounds = array<i64: 1, 32, 256>}]} {
    %c0 = arith.constant 0 : index
    %c0_0 = arith.constant 0 : index
    %c0_1 = arith.constant 0 : index
    %0 = vector.load %arg1[%c0, %c0_0, %c0_1] : memref<1x32x256xf32, #tpu.memory_space<vmem>>, vector<1x32x256xf32>
    %1 = vector.shape_cast %0 : vector<1x32x256xf32> to vector<32x256xf32>
    %c0_2 = arith.constant 0 : index
    %c0_3 = arith.constant 0 : index
    %2 = vector.load %arg2[%c0_2, %c0_3] : memref<96x32xf32, #tpu.memory_space<vmem>>, vector<96x32xf32>
    %c0_4 = arith.constant 0 : index
    %c0_5 = arith.constant 0 : index
    %3 = vector.load %arg3[%c0_4, %c0_5] : memref<32x32xf32, #tpu.memory_space<vmem>>, vector<32x32xf32>
    %c0_6 = arith.constant 0 : index
    %c0_7 = arith.constant 0 : index
    %4 = vector.load %arg4[%c0_6, %c0_7] : memref<32x1xf32, #tpu.memory_space<vmem>>, vector<32x1xf32>
    %cst = arith.constant dense<0.000000e+00> : vector<96x256xf32>
    %5 = tpu.matmul %2, %1, %cst {dimension_numbers = #tpu.dot_dimension_numbers<[1], [0], [0], [1], [0, 0, 1, 1], [], []>} : vector<96x32xf32>, vector<32x256xf32>, vector<96x256xf32> -> vector<96x256xf32>
    %6 = vector.extract_strided_slice %5 {offsets = [0, 0], sizes = [16, 256], strides = [1, 1]} : vector<96x256xf32> to vector<16x256xf32>
    %7 = vector.extract_strided_slice %5 {offsets = [32, 0], sizes = [16, 256], strides = [1, 1]} : vector<96x256xf32> to vector<16x256xf32>
    %8 = vector.extract_strided_slice %5 {offsets = [64, 0], sizes = [16, 256], strides = [1, 1]} : vector<96x256xf32> to vector<16x256xf32>
    %cst_8 = arith.constant dense<0.000000e+00> : vector<256x256xf32>
    %9 = tpu.matmul %6, %7, %cst_8 {dimension_numbers = #tpu.dot_dimension_numbers<[0], [0], [1], [1], [0, 1, 1, 1], [], []>} : vector<16x256xf32>, vector<16x256xf32>, vector<256x256xf32> -> vector<256x256xf32>
    %cst_9 = arith.constant dense<0xFF800000> : vector<256xf32>
    %10 = vector.multi_reduction <maximumf>, %9, %cst_9 [1] : vector<256x256xf32> to vector<256xf32>
    %11 = vector.shape_cast %10 : vector<256xf32> to vector<256x1xf32>
    %12 = vector.broadcast %11 : vector<256x1xf32> to vector<256x256xf32>
    %13 = arith.subf %9, %12 : vector<256x256xf32>
    %14 = math.exp %13 : vector<256x256xf32>
    %cst_10 = arith.constant dense<0.000000e+00> : vector<256xf32>
    %15 = vector.multi_reduction <add>, %14, %cst_10 [1] : vector<256x256xf32> to vector<256xf32>
    %16 = vector.shape_cast %15 : vector<256xf32> to vector<256x1xf32>
    %17 = tpu.reciprocal %16 {approx = true} : vector<256x1xf32> -> vector<256x1xf32>
    %18 = vector.broadcast %17 : vector<256x1xf32> to vector<256x256xf32>
    %19 = arith.mulf %14, %18 : vector<256x256xf32>
    %cst_11 = arith.constant dense<0.000000e+00> : vector<16x256xf32>
    %20 = tpu.matmul %8, %19, %cst_11 {dimension_numbers = #tpu.dot_dimension_numbers<[1], [1], [0], [0], [0, 0, 1, 0], [], []>} : vector<16x256xf32>, vector<256x256xf32>, vector<16x256xf32> -> vector<16x256xf32>
    %21 = vector.extract_strided_slice %5 {offsets = [16, 0], sizes = [16, 256], strides = [1, 1]} : vector<96x256xf32> to vector<16x256xf32>
    %22 = vector.extract_strided_slice %5 {offsets = [48, 0], sizes = [16, 256], strides = [1, 1]} : vector<96x256xf32> to vector<16x256xf32>
    %23 = vector.extract_strided_slice %5 {offsets = [80, 0], sizes = [16, 256], strides = [1, 1]} : vector<96x256xf32> to vector<16x256xf32>
    %cst_12 = arith.constant dense<0.000000e+00> : vector<256x256xf32>
    %24 = tpu.matmul %21, %22, %cst_12 {dimension_numbers = #tpu.dot_dimension_numbers<[0], [0], [1], [1], [0, 1, 1, 1], [], []>} : vector<16x256xf32>, vector<16x256xf32>, vector<256x256xf32> -> vector<256x256xf32>
    %cst_13 = arith.constant dense<0xFF800000> : vector<256xf32>
    %25 = vector.multi_reduction <maximumf>, %24, %cst_13 [1] : vector<256x256xf32> to vector<256xf32>
    %26 = vector.shape_cast %25 : vector<256xf32> to vector<256x1xf32>
    %27 = vector.broadcast %26 : vector<256x1xf32> to vector<256x256xf32>
    %28 = arith.subf %24, %27 : vector<256x256xf32>
    %29 = math.exp %28 : vector<256x256xf32>
    %cst_14 = arith.constant dense<0.000000e+00> : vector<256xf32>
    %30 = vector.multi_reduction <add>, %29, %cst_14 [1] : vector<256x256xf32> to vector<256xf32>
    %31 = vector.shape_cast %30 : vector<256xf32> to vector<256x1xf32>
    %32 = tpu.reciprocal %31 {approx = true} : vector<256x1xf32> -> vector<256x1xf32>
    %33 = vector.broadcast %32 : vector<256x1xf32> to vector<256x256xf32>
    %34 = arith.mulf %29, %33 : vector<256x256xf32>
    %cst_15 = arith.constant dense<0.000000e+00> : vector<16x256xf32>
    %35 = tpu.matmul %23, %34, %cst_15 {dimension_numbers = #tpu.dot_dimension_numbers<[1], [1], [0], [0], [0, 0, 1, 0], [], []>} : vector<16x256xf32>, vector<256x256xf32>, vector<16x256xf32> -> vector<16x256xf32>
    %36 = tpu.concatenate %20, %35 in 0 : vector<16x256xf32>, vector<16x256xf32> -> vector<32x256xf32>
    %cst_16 = arith.constant dense<0.000000e+00> : vector<32x256xf32>
    %37 = tpu.matmul %3, %36, %cst_16 {dimension_numbers = #tpu.dot_dimension_numbers<[1], [0], [0], [1], [0, 0, 1, 1], [], []>} : vector<32x32xf32>, vector<32x256xf32>, vector<32x256xf32> -> vector<32x256xf32>
    %38 = vector.broadcast %4 : vector<32x1xf32> to vector<32x256xf32>
    %39 = arith.addf %37, %38 : vector<32x256xf32>
    %c0_17 = arith.constant 0 : index
    %c0_18 = arith.constant 0 : index
    %c0_19 = arith.constant 0 : index
    %40 = vector.load %arg5[%c0_17, %c0_18, %c0_19] : memref<1x32x256xf32, #tpu.memory_space<vmem>>, vector<1x32x256xf32>
    %41 = vector.shape_cast %40 : vector<1x32x256xf32> to vector<32x256xf32>
    %42 = vector.shape_cast %39 : vector<32x256xf32> to vector<1x32x256xf32>
    tpu.vector_store %arg5[%c0_17, %c0_18, %c0_19], %42 {strides = array<i32>} : memref<1x32x256xf32, #tpu.memory_space<vmem>>, vector<1x32x256xf32>,
    return
  }
  func.func @transform_0(%arg0: i32) -> (i32, i32, i32) {
    %c0_i32 = arith.constant 0 : i32
    %c0_i32_0 = arith.constant 0 : i32
    %c0_i32_1 = arith.constant 0 : i32
    return %arg0, %c0_i32, %c0_i32_0 : i32, i32, i32
  }
  func.func @transform_1(%arg0: i32) -> (i32, i32) {
    %c0_i32 = arith.constant 0 : i32
    %c0_i32_0 = arith.constant 0 : i32
    %c0_i32_1 = arith.constant 0 : i32
    return %c0_i32, %c0_i32_0 : i32, i32
  }
  func.func @transform_2(%arg0: i32) -> (i32, i32) {
    %c0_i32 = arith.constant 0 : i32
    %c0_i32_0 = arith.constant 0 : i32
    %c0_i32_1 = arith.constant 0 : i32
    return %c0_i32, %c0_i32_0 : i32, i32
  }
  func.func @transform_3(%arg0: i32) -> (i32, i32) {
    %c0_i32 = arith.constant 0 : i32
    %c0_i32_0 = arith.constant 0 : i32
    %c0_i32_1 = arith.constant 0 : i32
    return %c0_i32, %c0_i32_0 : i32, i32
  }
  func.func @transform_4(%arg0: i32) -> (i32, i32, i32) {
    %c0_i32 = arith.constant 0 : i32
    %c0_i32_0 = arith.constant 0 : i32
    %c0_i32_1 = arith.constant 0 : i32
    return %arg0, %c0_i32, %c0_i32_0 : i32, i32, i32
  }
}

</mosaic_0001>

<bundles_post_ra>
// kernel: tpu_custom_call.1
= control target key start
LH: loop header
LB: loop body
LE: loop exit
PB: predicated region body
PF: predicated region fallthrough
CT: control target
= control target key end

     0   :  { %9 = vsyncpa [#allocation3], 0  ;;  %s4826_s0 = inlined_call_operand.vmem [shape: f32[2,32,256], index: 0, kind: input, shape index: {}]   ;;  %s4827_s1 = inlined_call_operand.vmem [shape: f32[96,32], index: 1, kind: input, shape index: {}]   ;;  %s4828_s2 = inlined_call_operand.hbm [shape: f32[32,32], index: 2, kind: input, shape index: {}]   ;;  %s4829_s3 = inlined_call_operand.vmem [shape: f32[32,1], index: 3, kind: input, shape index: {}]   ;;  %s4830_s4 = inlined_call_operand.hbm [shape: f32[2,32,256], index: 4, kind: output, shape index: {}]  }
   0x1   :  { %10 = vsyncpa [#allocation4], 0 }
   0x2   :  { %12 = vsyncpa [#allocation4 + $0x1], 0  ;;  %s3245_s15 = smov 0   ;;  %s3247_s16 = smov 0  }
   0x3   :  { %s3249_s17 = smov 0   ;;  %s3251_s18 = smov 0  }
   0x4 LB: > { %s3266_s19 = sadd.s32 4294967295, %s3212_s18   ;;  %s2489_s20 = sadd.s32 4294967294, %s3212_s18   ;;  %s3212_s18 = sphi %s3251_s18, %s5061_s18   ;;  %s3208_s17 = sphi %s3249_s17, %s5060_s17   ;;  %s3204_s16 = sphi %s3247_s16, %s5059_s16   ;;  %s3200_s15 = sphi %s3245_s15, %s5058_s15  }
   0x5   : > { %s3270_s21 = sadd.s32 1, %s3212_s18   ;;  %s114_s22 = sadd.s32 1, %s3208_s17 }
   0x6   : > { %s111_s23 = ssub.s32 %s3212_s18, %s3270_s21  ;;  %p124_p0 = scmp.ne.s32.totalorder %s3208_s17, %s3204_s16 }
   0x7   : > { %p112_p1 = scmp.eq.s32.totalorder %s111_s23, 0  ;;  %p125_p2 = scmp.eq.s32.totalorder %s3266_s19, 1 }
   0x8   : > { %p130_p3 = scmp.ne.s32.totalorder %s3204_s16, %s3200_s15  ;;  %p131_p4 = scmp.eq.s32.totalorder %s2489_s20, 1 }
   0x9   : > { %s3281_s24 = scalar_select %p112_p1, %s3208_s17, %s114_s22  }
   0xa   : > { %p3283_p5 = por %p125_p2, %p124_p0  ;;  %p3287_p6 = por %p131_p4, %p130_p3 }
   0xb   : > { %p2490_p7 = scmp.ge.s32.totalorder %s3212_s18, 1  ;;  %p138_p8 = scmp.lt.s32.totalorder %s3212_s18, 3 }
   0xc   : > { %p2687_p9 = scmp.eq.s32.totalorder %s3266_s19, 0  ;;  %s152_s29 = sshll.u32 %s4828_s2, 4  ;;  %s153_s29 = int_to_ptr.hbm [resolvable:$true] %s152_s29 }
   0xd   : > { %p139_p10 = pnand %p2490_p7, %p138_p8  ;;  %s3214_s30 = smov [#allocation2]  }
   0xe   : > { %s154_s5 = sshll.u32 %s3214_s30, 4  ;;  %s3215_s6 = smov 128   ;;  %s155_s5 = int_to_ptr.vmem [resolvable:$true] %s154_s5 }
   0xf   : > { %p2679_p11 = pneg %p139_p10  ;;  %s3216_s7 = smov 8  }
  0x10   : > { %181 = sbr.rel (%p139_p10) target bundleno = 2374 (0x946), region = 36 }
  0x11   : > { %p2680_p12 = pnand %p2687_p9, %p2679_p11 }
  0x13   : > { %2682 = dma.hbm_to_vmem [thread:$0]  (!%p2680_p12), %s153_s29, 512, %s155_s5, [#allocation3], %s3215_s6, %s3215_s6, %s3216_s7  }
  0x15   : > { %3191 = dma.done.wait (%p2687_p9), [#allocation3], 512  }
  0x16   : > { %3193 = vsyncadd (%p2687_p9), [#allocation3], 4294966784  ;;  %p208_p13 = scmp.lt.s32.totalorder %s3266_s19, 1  ;;  %v221_v7 = vld [vmem:[%s4827_s1] sm:$0xff]  ;;  %vm241_vm0 = vcmask 261120   ;;  %v222_v9 = vld [vmem:[%s4827_s1 + $0x8] sm:$0xff] }
  0x17   : > { %v223_v10 = vld [vmem:[%s4827_s1 + $0x10] sm:$0xff]  ;;  %v224_v11 = vld [vmem:[%s4827_s1 + $0x18] sm:$0xff]  ;;  %v225_v12 = vld [vmem:[%s4827_s1 + $0x20] sm:$0xff]  ;;  %vm448_vm1 = vcmask 130048   ;;  %s205_s11 = sand.u32 1, %s3204_s16   ;;  %s2664_s14 = sshll.u32 %s3266_s19, 6 }
  0x18   : > { %s209_s8 = scalar_select %p208_p13, %s3266_s19, 1  ;;  %v226_v13 = vld [vmem:[%s4827_s1 + $0x28] sm:$0xff]  ;;  %v229_v18 = vld [vmem:[%s4827_s1 + $0x40] sm:$0xff]  ;;  %v231_v20 = vld [vmem:[%s4827_s1 + $0x50] sm:$0xff] }
  0x19   : > { %v230_v19 = vld [vmem:[%s4827_s1 + $0x48] sm:$0xff]  ;;  %v232_v21 = vld [vmem:[%s4827_s1 + $0x58] sm:$0xff]  ;;  %s2411_s23 = scalar_lea.hbm %s4830_s4, %s2664_s14  ;;  %s2400_s29 = scalar_lea.sflag [#allocation4], %s205_s11 }
  0x1a   : > { %s2663_s9 = sshll.u32 %s209_s8, 6  ;;  %s2414_s28 = sshll.u32 %s2411_s23, 4  ;;  %s2415_s28 = int_to_ptr.hbm [resolvable:$true] %s2414_s28 }
  0x1b   : > { %s212_s12 = scalar_lea.vmem %s4826_s0, %s2663_s9  ;;  %s3160_s30 = sshra.s32 %s2415_s28, 4  ;;  %s3161_s30 = int_to_ptr.hbm [resolvable:$true] %s3160_s30 }
  0x1c   : > { %v219_v0 = vld [vmem:[%s212_s12 + $0x30] sm:$0xff]  ;;  %v217_v1 = vld [vmem:[%s212_s12 + $0x20] sm:$0xff]  ;;  %v220_v3 = vld [vmem:[%s212_s12 + $0x38] sm:$0xff]  ;;  %s3162_s5 = scalar_lea.hbm %s3161_s30, 64  ;;  %s3166_s7 = scalar_lea.hbm %s4830_s4, 128 }
  0x1d   : > { %290 = vmatpush.msra.mxu0 %v219_v0  ;;  %2665 = vmatpush.msra.mxu2 %v219_v0  ;;  %v215_v2 = vld [vmem:[%s212_s12 + $0x10] sm:$0xff]  ;;  %v218_v4 = vld [vmem:[%s212_s12 + $0x28] sm:$0xff]  ;;  %v213_v5 = vld [vmem:[%s212_s12] sm:$0xff]  ;;  %p3163_p0 = scmp.ne.s32.totalorder %s3161_s30, %s3162_s5  ;;  %p3167_p3 = scmp.lt.s32.totalorder %s3161_s30, %s4830_s4 }
  0x1e   : > { %343 = vmatpush.msra.mxu1 %v220_v3  ;;  %v216_v6 = vld [vmem:[%s212_s12 + $0x18] sm:$0xff]  ;;  %2669 = vmatpush.msra.mxu3 %v220_v3  ;;  %v214_v8 = vld [vmem:[%s212_s12 + $0x8] sm:$0xff]  ;;  %s2495_s12 = sshll.u32 %s205_s11, 6  ;;  %p3168_p4 = scmp.lt.s32.totalorder %s3166_s7, %s3162_s5 }
  0x1f   : > { %291 = vmatpush.msra.mxu0 %v217_v1  ;;  %2666 = vmatpush.msra.mxu2 %v217_v1  ;;  %s4782_s13 = scalar_lea.vmem [#allocation5], %s2495_s12  ;;  %p3164_p1 = pnand %p3163_p0, %p3283_p5 }
  0x20   : > { %344 = vmatpush.msra.mxu1 %v218_v4  ;;  %2670 = vmatpush.msra.mxu3 %v218_v4  ;;  %s2412_s27 = sshll.u32 %s4782_s13, 4  ;;  %p3169_p7 = por %p3168_p4, %p3167_p3  ;;  %s2413_s27 = int_to_ptr.vmem [resolvable:$true] %s2412_s27 }
  0x21   : > { %292 = vmatpush.msra.mxu0 %v215_v2  ;;  %2667 = vmatpush.msra.mxu2 %v215_v2  ;;  %p3165_p2 = pneg %p3164_p1 }
  0x22   : > { %345 = vmatpush.msra.mxu1 %v216_v6  ;;  %2671 = vmatpush.msra.mxu3 %v216_v6 }
  0x23   : > { %293 = vmatpush.msra.mxu0 %v213_v5  ;;  %2668 = vmatpush.msra.mxu2 %v213_v5  ;;  %p3170_p8 = pnand %p3169_p7, %p3165_p2 }
  0x24   : > { %2498 = vmatmul.msk.f32.vlgmr.msra.gmra.mxu0 %vm241_vm0, %v221_v7  ;;  %346 = vmatpush.msra.mxu1 %v214_v8 }
  0x25   : > { %2510 = vmatmul.msk.f32.vlgmr.msra.gmra.mxu1 %vm241_vm0, %v221_v7  ;;  %2672 = vmatpush.msra.mxu3 %v214_v8 }
  0x26   : > { %2506 = vmatmul.msk.f32.vlgmr.msra.gmra.mxu2 %vm241_vm0, %v229_v18  ;;  %2518 = vmatmul.msk.f32.vlgmr.msra.gmra.mxu3 %vm241_vm0, %v229_v18 }
  0x2c   : > { %2499 = vmatmul.msk.f32.gmra.mxu0 %vm241_vm0, %v222_v9 }
  0x2d   : > { %2511 = vmatmul.msk.f32.gmra.mxu1 %vm241_vm0, %v222_v9 }
  0x2e   : > { %2507 = vmatmul.msk.f32.gmra.mxu2 %vm241_vm0, %v230_v19  ;;  %2519 = vmatmul.msk.f32.gmra.mxu3 %vm241_vm0, %v230_v19 }
  0x34   : > { %2500 = vmatmul.msk.f32.gmra.mxu0 %vm241_vm0, %v223_v10 }
  0x35   : > { %2512 = vmatmul.msk.f32.gmra.mxu1 %vm241_vm0, %v223_v10 }
  0x36   : > { %2508 = vmatmul.msk.f32.gmra.mxu2 %vm241_vm0, %v231_v20  ;;  %2520 = vmatmul.msk.f32.gmra.mxu3 %vm241_vm0, %v231_v20 }
  0x3c   : > { %2501 = vmatmul.msk.f32.gmra.mxu0 %vm241_vm0, %v224_v11 }
  0x3d   : > { %2513 = vmatmul.msk.f32.gmra.mxu1 %vm241_vm0, %v224_v11 }
  0x3e   : > { %2509 = vmatmul.msk.f32.gmra.mxu2 %vm241_vm0, %v232_v21  ;;  %2521 = vmatmul.msk.f32.gmra.mxu3 %vm241_vm0, %v232_v21 }
  0x44   : > { %2502 = vmatmul.msk.f32.gmra.mxu0 %vm241_vm0, %v225_v12 }
  0x45   : > { %2514 = vmatmul.msk.f32.gmra.mxu1 %vm241_vm0, %v225_v12 }
  0x4c   : > { %2503 = vmatmul.msk.f32.gmra.mxu0 %vm241_vm0, %v226_v13 }
  0x4d   : > { %2515 = vmatmul.msk.f32.gmra.mxu1 %vm241_vm0, %v226_v13 }
  0xa1   : > { %v295_v14 = vpop.f32.mrf.mxu0 }
  0xa2   : > { %384 = vxpose.xlu0.b32.start [1/2] (short) %v295_v14, 128  ;;  %v348_v15 = vpop.f32.mrf.mxu1 }
  0xa3   : > { %416 = vxpose.xlu1.b32.start [1/2] (short) %v348_v15, 128 }
  0xa9   : > { %v298_v16 = vpop.f32.mrf.mxu0  ;;  %v3390_v42 = vpop.f32.mrf.mxu2 }
  0xaa   : > { %385 = vxpose.xlu0.b32.end [2/2] (short) %v298_v16, 128  ;;  %v351_v17 = vpop.f32.mrf.mxu1  ;;  %4904 = vst [vmem:[#allocation12_spill] sm:$0xff] %v3390_v42  ;;  %v3392_v43 = vpop.f32.mrf.mxu3 }
  0xab   : > { %417 = vxpose.xlu1.b32.end [2/2] (short) %v351_v17, 128  ;;  %4905 = vst [vmem:[#allocation13_spill] sm:$0xff] %v3392_v43 }
  0xb1   : > { %v3358_v22 = vpop.f32.mrf.mxu0  ;;  %v3396_v45 = vpop.f32.mrf.mxu2 }
  0xb2   : > { %4900 = vst [vmem:[#allocation8_spill] sm:$0xff] %v3358_v22  ;;  %v3360_v23 = vpop.f32.mrf.mxu1  ;;  %v3398_v46 = vpop.f32.mrf.mxu3 }
  0xb3   : > { %4901 = vst [vmem:[#allocation9_spill] sm:$0xff] %v3360_v23 }
  0xb4   : > { %4906 = vst [vmem:[#allocation14_spill] sm:$0xff] %v3396_v45 }
  0xb5   : > { %4907 = vst [vmem:[#allocation15_spill] sm:$0xff] %v3398_v46 }
  0xb9   : > { %v3362_v24 = vpop.f32.mrf.mxu0  ;;  %v3402_v48 = vpop.f32.mrf.mxu2 }
  0xba   : > { %4902 = vst [vmem:[#allocation10_spill] sm:$0xff] %v3362_v24  ;;  %v3364_v25 = vpop.f32.mrf.mxu1  ;;  %v3404_v50 = vpop.f32.mrf.mxu3 }
  0xbb   : > { %4903 = vst [vmem:[#allocation11_spill] sm:$0xff] %v3364_v25 }
  0xbc   : > { %4908 = vst [vmem:[#allocation16_spill] sm:$0xff] %v3402_v48 }
  0xbd   : > { %4909 = vst [vmem:[#allocation17_spill] sm:$0xff] %v3404_v50 }
  0xc1   : > { %v307_v26 = vpop.f32.mrf.mxu0  ;;  %v3410_v52 = vpop.f32.mrf.mxu2 }
  0xc2   : > { %v360_v27 = vpop.f32.mrf.mxu1  ;;  %4910 = vst [vmem:[#allocation18_spill] sm:$0xff] %v3410_v52  ;;  %v3412_v53 = vpop.f32.mrf.mxu3 }
  0xc3   : > { %4911 = vst [vmem:[#allocation19_spill] sm:$0xff] %v3412_v53 }
  0xc9   : > { %v310_v28 = vpop.f32.mrf.mxu0 }
  0xca   : > { %v363_v29 = vpop.f32.mrf.mxu1  ;;  %559 = vmatpush.msrb.mxu2 %v310_v28 }
  0xcb   : > { %672 = vmatpush.msrb.mxu3 %v363_v29 }
  0xcc   : > { %560 = vmatpush.msrb.mxu2 %v307_v26 }
  0xcd   : > { %673 = vmatpush.msrb.mxu3 %v360_v27 }
 0x146   : > { %v400_v30 = vpop.trf.xlu0 }
 0x147   : > { %2522 = vmatmul.msk.f32.vlgmr.msrb.gmra.mxu2 %vm448_vm1, %v400_v30  ;;  %2554 = vmatmul.msk.f32.vlgmr.msrb.gmra.mxu3 %vm448_vm1, %v400_v30  ;;  %v432_v54 = vpop.trf.xlu1 }
 0x14e   : > { %v401_v31 = vpop.trf.xlu0 }
 0x14f   : > { %2523 = vmatmul.msk.f32.gmra.mxu2 %vm448_vm1, %v401_v31  ;;  %2555 = vmatmul.msk.f32.gmra.mxu3 %vm448_vm1, %v401_v31  ;;  %v433_v57 = vpop.trf.xlu1 }
 0x156   : > { %v402_v32 = vpop.trf.xlu0 }
 0x157   : > { %2524 = vmatmul.msk.f32.gmra.mxu2 %vm448_vm1, %v402_v32  ;;  %2556 = vmatmul.msk.f32.gmra.mxu3 %vm448_vm1, %v402_v32  ;;  %v434_v60 = vpop.trf.xlu1 }
 0x15e   : > { %v403_v33 = vpop.trf.xlu0 }
 0x15f   : > { %2525 = vmatmul.msk.f32.gmra.mxu2 %vm448_vm1, %v403_v33  ;;  %2557 = vmatmul.msk.f32.gmra.mxu3 %vm448_vm1, %v403_v33  ;;  %v435_v63 = vpop.trf.xlu1 }
 0x166   : > { %v404_v34 = vpop.trf.xlu0 }
 0x167   : > { %2526 = vmatmul.msk.f32.gmra.mxu2 %vm448_vm1, %v404_v34  ;;  %2558 = vmatmul.msk.f32.gmra.mxu3 %vm448_vm1, %v404_v34  ;;  %v436_v2 = vpop.trf.xlu1 }
 0x16e   : > { %v405_v35 = vpop.trf.xlu0 }
 0x16f   : > { %2527 = vmatmul.msk.f32.gmra.mxu2 %vm448_vm1, %v405_v35  ;;  %2559 = vmatmul.msk.f32.gmra.mxu3 %vm448_vm1, %v405_v35  ;;  %v437_v5 = vpop.trf.xlu1 }
 0x176   : > { %v406_v36 = vpop.trf.xlu0 }
 0x177   : > { %2528 = vmatmul.msk.f32.gmra.mxu2 %vm448_vm1, %v406_v36  ;;  %2560 = vmatmul.msk.f32.gmra.mxu3 %vm448_vm1, %v406_v36  ;;  %v438_v8 = vpop.trf.xlu1 }
 0x17e   : > { %v407_v37 = vpop.trf.xlu0 }
 0x17f   : > { %2529 = vmatmul.msk.f32.gmra.mxu2 %vm448_vm1, %v407_v37  ;;  %2561 = vmatmul.msk.f32.gmra.mxu3 %vm448_vm1, %v407_v37  ;;  %v439_v11 = vpop.trf.xlu1 }
 0x186   : > { %v408_v38 = vpop.trf.xlu0 }
 0x187   : > { %2530 = vmatmul.msk.f32.gmra.mxu2 %vm448_vm1, %v408_v38  ;;  %2562 = vmatmul.msk.f32.gmra.mxu3 %vm448_vm1, %v408_v38  ;;  %v440_v14 = vpop.trf.xlu1 }
 0x18e   : > { %v409_v39 = vpop.trf.xlu0 }
 0x18f   : > { %2531 = vmatmul.msk.f32.gmra.mxu2 %vm448_vm1, %v409_v39  ;;  %2563 = vmatmul.msk.f32.gmra.mxu3 %vm448_vm1, %v409_v39  ;;  %v441_v17 = vpop.trf.xlu1 }
 0x196   : > { %v410_v40 = vpop.trf.xlu0 }
 0x197   : > { %2532 = vmatmul.msk.f32.gmra.mxu2 %vm448_vm1, %v410_v40  ;;  %2564 = vmatmul.msk.f32.gmra.mxu3 %vm448_vm1, %v410_v40  ;;  %v442_v20 = vpop.trf.xlu1 }
 0x19e   : > { %v411_v41 = vpop.trf.xlu0 }
 0x19f   : > { %2533 = vmatmul.msk.f32.gmra.mxu2 %vm448_vm1, %v411_v41  ;;  %2565 = vmatmul.msk.f32.gmra.mxu3 %vm448_vm1, %v411_v41  ;;  %v443_v27 = vpop.trf.xlu1 }
 0x1a6   : > { %v412_v44 = vpop.trf.xlu0 }
 0x1a7   : > { %2534 = vmatmul.msk.f32.gmra.mxu2 %vm448_vm1, %v412_v44  ;;  %2566 = vmatmul.msk.f32.gmra.mxu3 %vm448_vm1, %v412_v44  ;;  %v444_v31 = vpop.trf.xlu1 }
 0x1ae   : > { %v413_v47 = vpop.trf.xlu0 }
 0x1af   : > { %2535 = vmatmul.msk.f32.gmra.mxu2 %vm448_vm1, %v413_v47  ;;  %2567 = vmatmul.msk.f32.gmra.mxu3 %vm448_vm1, %v413_v47  ;;  %v445_v36 = vpop.trf.xlu1 }
 0x1b6   : > { %v414_v49 = vpop.trf.xlu0 }
 0x1b7   : > { %2536 = vmatmul.msk.f32.gmra.mxu2 %vm448_vm1, %v414_v49  ;;  %2568 = vmatmul.msk.f32.gmra.mxu3 %vm448_vm1, %v414_v49  ;;  %v446_v41 = vpop.trf.xlu1 }
 0x1be   : > { %v415_v51 = vpop.trf.xlu0 }
 0x1bf   : > { %2537 = vmatmul.msk.f32.gmra.mxu2 %vm448_vm1, %v415_v51  ;;  %2569 = vmatmul.msk.f32.gmra.mxu3 %vm448_vm1, %v415_v51 }
 0x1c7   : > { %2538 = vmatmul.msk.f32.gmra.mxu2 %vm448_vm1, %v432_v54  ;;  %2570 = vmatmul.msk.f32.gmra.mxu3 %vm448_vm1, %v432_v54 }
 0x1ca   : > { %v3416_v55 = vpop.f32.mrf.mxu2  ;;  %v3418_v56 = vpop.f32.mrf.mxu3 }
 0x1cf   : > { %2539 = vmatmul.msk.f32.gmra.mxu2 %vm448_vm1, %v433_v57  ;;  %2571 = vmatmul.msk.f32.gmra.mxu3 %vm448_vm1, %v433_v57 }
 0x1d2   : > { %v3422_v58 = vpop.f32.mrf.mxu2  ;;  %v3424_v59 = vpop.f32.mrf.mxu3 }
 0x1d3   : > { %4912 = vst [vmem:[#allocation20_spill] sm:$0xff] %v3422_v58 }
 0x1d4   : > { %4913 = vst [vmem:[#allocation21_spill] sm:$0xff] %v3424_v59 }
 0x1d7   : > { %2540 = vmatmul.msk.f32.gmra.mxu2 %vm448_vm1, %v434_v60  ;;  %2572 = vmatmul.msk.f32.gmra.mxu3 %vm448_vm1, %v434_v60 }
 0x1da   : > { %v3428_v61 = vpop.f32.mrf.mxu2  ;;  %v3430_v62 = vpop.f32.mrf.mxu3 }
 0x1df   : > { %2541 = vmatmul.msk.f32.gmra.mxu2 %vm448_vm1, %v435_v63  ;;  %2573 = vmatmul.msk.f32.gmra.mxu3 %vm448_vm1, %v435_v63 }
 0x1e2   : > { %v3434_v0 = vpop.f32.mrf.mxu2  ;;  %v3436_v1 = vpop.f32.mrf.mxu3 }
 0x1e7   : > { %2542 = vmatmul.msk.f32.gmra.mxu2 %vm448_vm1, %v436_v2  ;;  %2574 = vmatmul.msk.f32.gmra.mxu3 %vm448_vm1, %v436_v2 }
 0x1ea   : > { %v3440_v3 = vpop.f32.mrf.mxu2  ;;  %v3442_v4 = vpop.f32.mrf.mxu3 }
 0x1ef   : > { %2543 = vmatmul.msk.f32.gmra.mxu2 %vm448_vm1, %v437_v5  ;;  %2575 = vmatmul.msk.f32.gmra.mxu3 %vm448_vm1, %v437_v5 }
 0x1f2   : > { %v3446_v6 = vpop.f32.mrf.mxu2  ;;  %v3448_v7 = vpop.f32.mrf.mxu3 }
 0x1f7   : > { %2544 = vmatmul.msk.f32.gmra.mxu2 %vm448_vm1, %v438_v8  ;;  %2576 = vmatmul.msk.f32.gmra.mxu3 %vm448_vm1, %v438_v8 }
 0x1fa   : > { %v3452_v9 = vpop.f32.mrf.mxu2  ;;  %v3454_v10 = vpop.f32.mrf.mxu3 }
 0x1fb   : > { %v789_v2 = vmax.f32 %v3452_v9, %v3454_v10 }
 0x1ff   : > { %2545 = vmatmul.msk.f32.gmra.mxu2 %vm448_vm1, %v439_v11  ;;  %2577 = vmatmul.msk.f32.gmra.mxu3 %vm448_vm1, %v439_v11  ;;  %v786_v11 = vmax.f32 %v3446_v6, %v3448_v7 }
 0x202   : > { %v3458_v12 = vpop.f32.mrf.mxu2  ;;  %v3460_v13 = vpop.f32.mrf.mxu3 }
 0x203   : > { %v792_v57 = vmax.f32 %v3458_v12, %v3460_v13 }
 0x207   : > { %2546 = vmatmul.msk.f32.gmra.mxu2 %vm448_vm1, %v440_v14  ;;  %2578 = vmatmul.msk.f32.gmra.mxu3 %vm448_vm1, %v440_v14 }
 0x20a   : > { %v3464_v15 = vpop.f32.mrf.mxu2  ;;  %v3466_v16 = vpop.f32.mrf.mxu3 }
 0x20b   : > { %v795_v49 = vmax.f32 %v3464_v15, %v3466_v16 }
 0x20f   : > { %2547 = vmatmul.msk.f32.gmra.mxu2 %vm448_vm1, %v441_v17  ;;  %2579 = vmatmul.msk.f32.gmra.mxu3 %vm448_vm1, %v441_v17 }
 0x212   : > { %v3470_v18 = vpop.f32.mrf.mxu2  ;;  %v3472_v19 = vpop.f32.mrf.mxu3 }
 0x213   : > { %v798_v39 = vmax.f32 %v3470_v18, %v3472_v19 }
 0x217   : > { %2548 = vmatmul.msk.f32.gmra.mxu2 %vm448_vm1, %v442_v20  ;;  %2580 = vmatmul.msk.f32.gmra.mxu3 %vm448_vm1, %v442_v20  ;;  %v783_v20 = vmax.f32 %v3440_v3, %v3442_v4 }
 0x21a   : > { %v3476_v21 = vpop.f32.mrf.mxu2  ;;  %v3478_v26 = vpop.f32.mrf.mxu3 }
 0x21b   : > { %v801_v34 = vmax.f32 %v3476_v21, %v3478_v26 }
 0x21f   : > { %2549 = vmatmul.msk.f32.gmra.mxu2 %vm448_vm1, %v443_v27  ;;  %2581 = vmatmul.msk.f32.gmra.mxu3 %vm448_vm1, %v443_v27 }
 0x222   : > { %v3482_v28 = vpop.f32.mrf.mxu2  ;;  %v3484_v29 = vpop.f32.mrf.mxu3 }
 0x223   : > { %v804_v30 = vmax.f32 %v3482_v28, %v3484_v29 }
 0x225   : > { %805 = vmax.xlane.f32.xlu2 %v804_v30 }
 0x227   : > { %2550 = vmatmul.msk.f32.gmra.mxu2 %vm448_vm1, %v444_v31  ;;  %2582 = vmatmul.msk.f32.gmra.mxu3 %vm448_vm1, %v444_v31  ;;  %v780_v31 = vmax.f32 %v3434_v0, %v3436_v1 }
 0x22a   : > { %v3490_v32 = vpop.f32.mrf.mxu2  ;;  %v3492_v33 = vpop.f32.mrf.mxu3 }
 0x22b   : > { %v807_v35 = vmax.f32 %v3490_v32, %v3492_v33 }
 0x22d   : > { %802 = vmax.xlane.f32.xlu2 %v801_v34  ;;  %808 = vmax.xlane.f32.xlu1 %v807_v35  ;;  %v447_v34 = vpop.trf.xlu1 }
 0x22f   : > { %2551 = vmatmul.msk.f32.gmra.mxu2 %vm448_vm1, %v445_v36  ;;  %2583 = vmatmul.msk.f32.gmra.mxu3 %vm448_vm1, %v445_v36 }
 0x232   : > { %v3500_v37 = vpop.f32.mrf.mxu2  ;;  %v3502_v38 = vpop.f32.mrf.mxu3 }
 0x233   : > { %v810_v40 = vmax.f32 %v3500_v37, %v3502_v38 }
 0x235   : > { %799 = vmax.xlane.f32.xlu2 %v798_v39  ;;  %811 = vmax.xlane.f32.xlu0 %v810_v40  ;;  %v777_v39 = vmax.f32 %v3428_v61, %v3430_v62 }
 0x237   : > { %2552 = vmatmul.msk.f32.gmra.mxu2 %vm448_vm1, %v446_v41  ;;  %2584 = vmatmul.msk.f32.gmra.mxu3 %vm448_vm1, %v446_v41 }
 0x23a   : > { %v3510_v44 = vpop.f32.mrf.mxu2  ;;  %v3512_v47 = vpop.f32.mrf.mxu3 }
 0x23d   : > { %796 = vmax.xlane.f32.xlu2 %v795_v49  ;;  %v774_v49 = vmax.f32 %v3422_v58, %v3424_v59 }
 0x23f   : > { %2553 = vmatmul.msk.f32.gmra.mxu2 %vm448_vm1, %v447_v34  ;;  %2585 = vmatmul.msk.f32.gmra.mxu3 %vm448_vm1, %v447_v34 }
 0x242   : > { %v3516_v51 = vpop.f32.mrf.mxu2  ;;  %v3518_v54 = vpop.f32.mrf.mxu3 }
 0x245   : > { %793 = vmax.xlane.f32.xlu2 %v792_v57  ;;  %v771_v57 = vmax.f32 %v3416_v55, %v3418_v56 }
 0x24a   : > { %v3522_v60 = vpop.f32.mrf.mxu2  ;;  %v3524_v63 = vpop.f32.mrf.mxu3 }
 0x24b   : > { %v819_v17 = vmax.f32 %v3522_v60, %v3524_v63 }
 0x24d   : > { %790 = vmax.xlane.f32.xlu2 %v789_v2 }
 0x252   : > { %v3528_v5 = vpop.f32.mrf.mxu2  ;;  %v3530_v8 = vpop.f32.mrf.mxu3 }
 0x253   : > { %4914 = vst [vmem:[#allocation22_spill] sm:$0xff] %v3528_v5  ;;  %v822_v14 = vmax.f32 %v3528_v5, %v3530_v8 }
 0x254   : > { %4915 = vst [vmem:[#allocation23_spill] sm:$0xff] %v3530_v8 }
 0x255   : > { %787 = vmax.xlane.f32.xlu2 %v786_v11  ;;  %823 = vmax.xlane.f32.xlu0 %v822_v14  ;;  %v813_v14 = vmax.f32 %v3510_v44, %v3512_v47 }
 0x25a   : > { %v3540_v27 = vpop.f32.mrf.mxu2  ;;  %v3542_v30 = vpop.f32.mrf.mxu3 }
 0x25d   : > { %784 = vmax.xlane.f32.xlu2 %v783_v20  ;;  %820 = vmax.xlane.f32.xlu0 %v819_v17 }
 0x262   : > { %v3548_v35 = vpop.f32.mrf.mxu2  ;;  %v3550_v36 = vpop.f32.mrf.mxu3 }
 0x265   : > { %781 = vmax.xlane.f32.xlu2 %v780_v31  ;;  %v816_v31 = vmax.f32 %v3516_v51, %v3518_v54 }
 0x26a   : > { %v3554_v40 = vpop.f32.mrf.mxu2  ;;  %v3556_v41 = vpop.f32.mrf.mxu3 }
 0x26b   : > { %4916 = vst [vmem:[#allocation24_spill] sm:$0xff] %v3554_v40 }
 0x26c   : > { %4917 = vst [vmem:[#allocation25_spill] sm:$0xff] %v3556_v41 }
 0x26d   : > { %778 = vmax.xlane.f32.xlu2 %v777_v39 }
 0x272   : > { %v3562_v2 = vpop.f32.mrf.mxu2  ;;  %v3564_v11 = vpop.f32.mrf.mxu3 }
 0x275   : > { %775 = vmax.xlane.f32.xlu2 %v774_v49  ;;  %v834_v49 = vmax.f32 %v3562_v2, %v3564_v11 }
 0x27a   : > { %v3568_v17 = vpop.f32.mrf.mxu2  ;;  %v3570_v20 = vpop.f32.mrf.mxu3 }
 0x27d   : > { %772 = vmax.xlane.f32.xlu2 %v771_v57 }
 0x282   : > { %v3574_v34 = vpop.f32.mrf.mxu2  ;;  %v3576_v39 = vpop.f32.mrf.mxu3 }
 0x283   : > { %4918 = vst [vmem:[#allocation26_spill] sm:$0xff] %v3574_v34 }
 0x284   : > { %4919 = vst [vmem:[#allocation27_spill] sm:$0xff] %v3576_v39 }
 0x285   : > { %814 = vmax.xlane.f32.xlu2 %v813_v14  ;;  %v837_v14 = vmax.f32 %v3568_v17, %v3570_v20 }
 0x28a   : > { %v3582_v53 = vpop.f32.mrf.mxu2  ;;  %v3584_v52 = vpop.f32.mrf.mxu3 }
 0x28d   : > { %817 = vmax.xlane.f32.xlu2 %v816_v31  ;;  %v840_v31 = vmax.f32 %v3574_v34, %v3576_v39 }
 0x292   : > { %v3588_v48 = vpop.f32.mrf.mxu2  ;;  %v3590_v46 = vpop.f32.mrf.mxu3 }
 0x295   : > { %835 = vmax.xlane.f32.xlu2 %v834_v49 }
 0x298   : > { %v806_v57 = vpop.xlane.xlu2 %805 }
 0x29a   : > { %v3600_v5 = vpop.f32.mrf.mxu2 }
 0x29d   : > { %838 = vmax.xlane.f32.xlu2 %v837_v14  ;;  %v843_v14 = vmax.f32 %v3582_v53, %v3584_v52 }
 0x2a0   : > { %v803_v50 = vpop.xlane.xlu2 %802  ;;  %v809_v45 = vpop.xlane.xlu1 %808 }
 0x2a1   : > { %v891_v23 = vsub.f32 %v3490_v32, %v809_v45  ;;  %v892_v22 = vsub.f32 %v3492_v33, %v809_v45  ;;  %v889_v33 = vsub.f32 %v3482_v28, %v806_v57 }
 0x2a3   : > { %v979_v59 = vmul.f32 1.442695, %v891_v23  ;;  %v981_v58 = vmul.f32 1.442695, %v892_v22  ;;  %v890_v23 = vsub.f32 %v3484_v29, %v806_v57 }
 0x2a5   : > { %841 = vmax.xlane.f32.xlu2 %v840_v31  ;;  %v3602_v31 = vpop.f32.mrf.mxu3  ;;  %v977_v29 = vmul.f32 1.442695, %v890_v23 }
 0x2a6   : > { %v849_v28 = vmax.f32 %v3600_v5, %v3602_v31 }
 0x2a8   : > { %v3592_v49 = vpop.xlane.xlu2 %799  ;;  %v812_v43 = vpop.xlane.xlu0 %811 }
 0x2a9   : > { %v893_v42 = vsub.f32 %v3500_v37, %v812_v43  ;;  %v894_v25 = vsub.f32 %v3502_v38, %v812_v43 }
 0x2ab   : > { %v983_v24 = vmul.f32 1.442695, %v893_v42  ;;  %v985_v8 = vmul.f32 1.442695, %v894_v25  ;;  %v846_v42 = vmax.f32 %v3588_v48, %v3590_v46 }
 0x2ad   : > { %844 = vmax.xlane.f32.xlu2 %v843_v14  ;;  %2732 = vpow2.f32 %v983_v24 }
 0x2ae   : > { %2734 = vpow2.f32 %v985_v8  ;;  %v975_v8 = vmul.f32 1.442695, %v889_v33 }
 0x2af   : > { %2736 = vpow2.f32 %v979_v59 }
 0x2b0   : > { %v797_v37 = vpop.xlane.xlu2 %796  ;;  %2738 = vpow2.f32 %v981_v58 }
 0x2b1   : > { %v883_v43 = vsub.f32 %v3464_v15, %v797_v37  ;;  %v884_v38 = vsub.f32 %v3466_v16, %v797_v37  ;;  %v3616_v15 = vpop.f32.mrf.mxu2  ;;  %v3620_v16 = vpop.f32.mrf.mxu3 }
 0x2b2   : > { %v852_v23 = vmax.f32 %v3616_v15, %v3620_v16 }
 0x2b3   : > { %v963_v45 = vmul.f32 1.442695, %v883_v43  ;;  %v965_v25 = vmul.f32 1.442695, %v884_v38  ;;  %v3608_v32 = vpop.eup %2732  ;;  %v887_v43 = vsub.f32 %v3476_v21, %v803_v50 }
 0x2b4   : > { %4920 = vst [vmem:[#allocation28_spill] sm:$0xff] %v3608_v32  ;;  %v3611_v22 = vpop.eup %2734 }
 0x2b5   : > { %2740 = vpow2.f32 %v963_v45  ;;  %847 = vmax.xlane.f32.xlu2 %v846_v42  ;;  %4921 = vst [vmem:[#allocation29_spill] sm:$0xff] %v3611_v22  ;;  %v1098_v24 = vadd.f32 %v3611_v22, %v3608_v32  ;;  %v3622_v58 = vpop.eup %2736  ;;  %v888_v42 = vsub.f32 %v3478_v26, %v803_v50  ;;  %v971_v33 = vmul.f32 1.442695, %v887_v43 }
 0x2b6   : > { %2742 = vpow2.f32 %v965_v25  ;;  %4922 = vst [vmem:[#allocation30_spill] sm:$0xff] %v3622_v58  ;;  %v3626_v14 = vpop.eup %2738  ;;  %v885_v50 = vsub.f32 %v3470_v18, %v3592_v49  ;;  %v886_v26 = vsub.f32 %v3472_v19, %v3592_v49 }
 0x2b7   : > { %1099 = vadd.xlane.f32.xlu1 %v1098_v24  ;;  %4923 = vst [vmem:[#allocation31_spill] sm:$0xff] %v3626_v14  ;;  %2744 = vpow2.f32 %v975_v8  ;;  %v1095_v45 = vadd.f32 %v3626_v14, %v3622_v58  ;;  %v973_v24 = vmul.f32 1.442695, %v888_v42 }
 0x2b8   : > { %v3618_v59 = vpop.xlane.xlu2 %793  ;;  %2746 = vpow2.f32 %v977_v29  ;;  %v967_v42 = vmul.f32 1.442695, %v885_v50 }
 0x2b9   : > { %v3642_v21 = vpop.f32.mrf.mxu2  ;;  %v3644_v8 = vpop.f32.mrf.mxu3  ;;  %2748 = vpow2.f32 %v971_v33 }
 0x2ba   : > { %2750 = vpow2.f32 %v973_v24 }
 0x2bb   : > { %v3628_v57 = vpop.eup %2740  ;;  %2752 = vpow2.f32 %v967_v42 }
 0x2bc   : > { %4924 = vst [vmem:[#allocation32_spill] sm:$0xff] %v3628_v57  ;;  %v3630_v37 = vpop.eup %2742 }
 0x2bd   : > { %4925 = vst [vmem:[#allocation33_spill] sm:$0xff] %v3630_v37  ;;  %850 = vmax.xlane.f32.xlu2 %v849_v28  ;;  %v1083_v38 = vadd.f32 %v3630_v37, %v3628_v57  ;;  %v3646_v28 = vpop.eup %2744  ;;  %v969_v37 = vmul.f32 1.442695, %v886_v26 }
 0x2be   : > { %4926 = vst [vmem:[#allocation34_spill] sm:$0xff] %v3646_v28  ;;  %v3648_v29 = vpop.eup %2746 }
 0x2bf   : > { %1084 = vadd.xlane.f32.xlu0 %v1083_v38  ;;  %1096 = vadd.xlane.f32.xlu1 %v1095_v45  ;;  %4927 = vst [vmem:[#allocation35_spill] sm:$0xff] %v3648_v29  ;;  %v1092_v43 = vadd.f32 %v3648_v29, %v3646_v28  ;;  %v855_v45 = vmax.f32 %v3642_v21, %v3644_v8  ;;  %v3660_v33 = vpop.eup %2748  ;;  %2754 = vpow2.f32 %v969_v37 }
 0x2c0   : > { %v3638_v25 = vpop.xlane.xlu2 %790  ;;  %4928 = vst [vmem:[#allocation36_spill] sm:$0xff] %v3660_v33  ;;  %v3662_v57 = vpop.eup %2750 }
 0x2c1   : > { %4929 = vst [vmem:[#allocation37_spill] sm:$0xff] %v3662_v57  ;;  %v3664_v18 = vpop.f32.mrf.mxu2  ;;  %v1089_v19 = vadd.f32 %v3662_v57, %v3660_v33  ;;  %v3674_v50 = vpop.eup %2752 }
 0x2c2   : > { %4930 = vst [vmem:[#allocation38_spill] sm:$0xff] %v3674_v50 }
 0x2c5   : > { %853 = vmax.xlane.f32.xlu2 %v852_v23  ;;  %v3666_v23 = vpop.f32.mrf.mxu3  ;;  %v3676_v26 = vpop.eup %2754 }
 0x2c6   : > { %v858_v24 = vmax.f32 %v3664_v18, %v3666_v23  ;;  %4931 = vst [vmem:[#allocation39_spill] sm:$0xff] %v3676_v26  ;;  %v1086_v37 = vadd.f32 %v3676_v26, %v3674_v50 }
 0x2c7   : > { %1093 = vadd.xlane.f32.xlu1 %v1092_v43 }
 0x2c8   : > { %v3656_v38 = vpop.xlane.xlu2 %787 }
 0x2c9   : > { %v3678_v43 = vpop.f32.mrf.mxu2 }
 0x2cd   : > { %856 = vmax.xlane.f32.xlu2 %v855_v45  ;;  %v3680_v29 = vpop.f32.mrf.mxu3 }
 0x2ce   : > { %v861_v45 = vmax.f32 %v3678_v43, %v3680_v29 }
 0x2cf   : > { %1090 = vadd.xlane.f32.xlu1 %v1089_v19 }
 0x2d0   : > { %v3670_v49 = vpop.xlane.xlu2 %784 }
 0x2d1   : > { %v3702_v32 = vpop.f32.mrf.mxu2 }
 0x2d5   : > { %859 = vmax.xlane.f32.xlu2 %v858_v24 }
 0x2d7   : > { %1087 = vadd.xlane.f32.xlu1 %v1086_v37 }
 0x2d8   : > { %v3684_v42 = vpop.xlane.xlu2 %781 }
 0x2dd   : > { %862 = vmax.xlane.f32.xlu2 %v861_v45 }
 0x2e0   : > { %v3688_v19 = vpop.xlane.xlu2 %778 }
 0x2e8   : > { %v3690_v57 = vpop.xlane.xlu2 %775 }
 0x2e9   : > { %4932 = vst [vmem:[#allocation40_spill] sm:$0xff] %v3690_v57 }
 0x2f0   : > { %v3692_v33 = vpop.xlane.xlu2 %772 }
 0x2f8   : > { %v815_v24 = vpop.xlane.xlu2 %814 }
 0x2f9   : > { %v895_v28 = vsub.f32 %v3510_v44, %v815_v24  ;;  %v896_v14 = vsub.f32 %v3512_v47, %v815_v24  ;;  %v3706_v44 = vpop.f32.mrf.mxu3 }
 0x2fa   : > { %v864_v47 = vmax.f32 %v3702_v32, %v3706_v44 }
 0x2fb   : > { %v987_v58 = vmul.f32 1.442695, %v895_v28  ;;  %v989_v26 = vmul.f32 1.442695, %v896_v14  ;;  %v831_v14 = vmax.f32 %v3554_v40, %v3556_v41  ;;  %v878_v40 = vsub.f32 %v3448_v7, %v3656_v38 }
 0x2fd   : > { %2756 = vpow2.f32 %v987_v58 }
 0x2fe   : > { %2758 = vpow2.f32 %v989_v26 }
 0x300   : > { %v818_v37 = vpop.xlane.xlu2 %817 }
 0x301   : > { %v897_v26 = vsub.f32 %v3516_v51, %v818_v37  ;;  %v898_v24 = vsub.f32 %v3518_v54, %v818_v37 }
 0x303   : > { %v3696_v50 = vpop.eup %2756 }
 0x304   : > { %4933 = vst [vmem:[#allocation41_spill] sm:$0xff] %v3696_v50  ;;  %v3698_v22 = vpop.eup %2758 }
 0x305   : > { %4934 = vst [vmem:[#allocation42_spill] sm:$0xff] %v3698_v22  ;;  %v1101_v45 = vadd.f32 %v3698_v22, %v3696_v50  ;;  %v991_v22 = vmul.f32 1.442695, %v897_v26  ;;  %v993_v50 = vmul.f32 1.442695, %v898_v24  ;;  %v877_v24 = vsub.f32 %v3446_v6, %v3656_v38 }
 0x306   : > { %v880_v6 = vsub.f32 %v3454_v10, %v3638_v25 }
 0x307   : > { %1102 = vadd.xlane.f32.xlu2 %v1101_v45  ;;  %v828_v45 = vmax.f32 %v3548_v35, %v3550_v36  ;;  %2760 = vpow2.f32 %v991_v22  ;;  %v951_v34 = vmul.f32 1.442695, %v877_v24 }
 0x308   : > { %v3704_v57 = vpop.xlane.xlu2 %835  ;;  %2762 = vpow2.f32 %v993_v50 }
 0x30d   : > { %v3724_v41 = vpop.eup %2760 }
 0x30e   : > { %4935 = vst [vmem:[#allocation43_spill] sm:$0xff] %v3724_v41  ;;  %v3726_v51 = vpop.eup %2762 }
 0x30f   : > { %865 = vmax.xlane.f32.xlu2 %v864_v47  ;;  %v825_v47 = vmax.f32 %v3540_v27, %v3542_v30  ;;  %4936 = vst [vmem:[#allocation44_spill] sm:$0xff] %v3726_v51  ;;  %v1104_v54 = vadd.f32 %v3726_v51, %v3724_v41  ;;  %v953_v51 = vmul.f32 1.442695, %v878_v40  ;;  %v879_v41 = vsub.f32 %v3452_v9, %v3638_v25 }
 0x310   : > { %v3710_v58 = vpop.xlane.xlu2 %838 }
 0x311   : > { %v955_v9 = vmul.f32 1.442695, %v879_v41 }
 0x317   : > { %832 = vmax.xlane.f32.xlu2 %v831_v14 }
 0x318   : > { %v3714_v28 = vpop.xlane.xlu2 %841 }
 0x31f   : > { %829 = vmax.xlane.f32.xlu2 %v828_v45 }
 0x320   : > { %v845_v39 = vpop.xlane.xlu2 %844 }
 0x321   : > { %v915_v7 = vsub.f32 %v3582_v53, %v845_v39  ;;  %v916_v40 = vsub.f32 %v3584_v52, %v845_v39  ;;  %v871_v53 = vsub.f32 %v3428_v61, %v3688_v19  ;;  %v872_v39 = vsub.f32 %v3430_v62, %v3688_v19 }
 0x323   : > { %v1027_v10 = vmul.f32 1.442695, %v915_v7  ;;  %v1029_v25 = vmul.f32 1.442695, %v916_v40  ;;  %v941_v19 = vmul.f32 1.442695, %v872_v39 }
 0x327   : > { %826 = vmax.xlane.f32.xlu2 %v825_v47 }
 0x328   : > { %v3722_v14 = vpop.xlane.xlu2 %847 }
 0x329   : > { %v918_v61 = vsub.f32 %v3590_v46, %v3722_v14 }
 0x32f   : > { %1105 = vadd.xlane.f32.xlu2 %v1104_v54 }
 0x330   : > { %v3730_v37 = vpop.xlane.xlu2 %850 }
 0x338   : > { %v854_v26 = vpop.xlane.xlu2 %853 }
 0x339   : > { %v921_v22 = vsub.f32 %v3616_v15, %v854_v26  ;;  %v922_v50 = vsub.f32 %v3620_v16, %v854_v26 }
 0x33b   : > { %v1039_v45 = vmul.f32 1.442695, %v921_v22  ;;  %v1041_v47 = vmul.f32 1.442695, %v922_v50 }
 0x33d   : > { %2764 = vpow2.f32 %v1039_v45 }
 0x33e   : > { %2766 = vpow2.f32 %v1041_v47  ;;  %v917_v47 = vsub.f32 %v3588_v48, %v3722_v14  ;;  %v873_v14 = vsub.f32 %v3434_v0, %v3684_v42 }
 0x33f   : > { %2768 = vpow2.f32 %v951_v34 }
 0x340   : > { %v857_v54 = vpop.xlane.xlu2 %856  ;;  %2770 = vpow2.f32 %v953_v51  ;;  %v1031_v48 = vmul.f32 1.442695, %v917_v47 }
 0x341   : > { %v923_v15 = vsub.f32 %v3642_v21, %v857_v54  ;;  %v924_v16 = vsub.f32 %v3644_v8, %v857_v54  ;;  %v957_v8 = vmul.f32 1.442695, %v880_v6 }
 0x343   : > { %v3744_v26 = vpop.eup %2764  ;;  %v1043_v38 = vmul.f32 1.442695, %v923_v15  ;;  %v1045_v22 = vmul.f32 1.442695, %v924_v16 }
 0x344   : > { %v3747_v50 = vpop.eup %2766 }
 0x345   : > { %2772 = vpow2.f32 %v1043_v38  ;;  %v1140_v21 = vadd.f32 %v3747_v50, %v3744_v26  ;;  %v3752_v24 = vpop.eup %2768  ;;  %v1033_v38 = vmul.f32 1.442695, %v918_v61  ;;  %v911_v61 = vsub.f32 %v3568_v17, %v3710_v58 }
 0x346   : > { %2774 = vpow2.f32 %v1045_v22  ;;  %v3758_v41 = vpop.eup %2770 }
 0x347   : > { %1141 = vadd.xlane.f32.xlu0 %v1140_v21  ;;  %2776 = vpow2.f32 %v955_v9 }
 0x348   : > { %v860_v34 = vpop.xlane.xlu2 %859  ;;  %2778 = vpow2.f32 %v957_v8  ;;  %v874_v8 = vsub.f32 %v3436_v1, %v3684_v42 }
 0x349   : > { %v925_v51 = vsub.f32 %v3664_v18, %v860_v34  ;;  %v926_v52 = vsub.f32 %v3666_v23, %v860_v34  ;;  %2780 = vpow2.f32 %v1027_v10  ;;  %v939_v18 = vmul.f32 1.442695, %v871_v53 }
 0x34a   : > { %2782 = vpow2.f32 %v1029_v25  ;;  %v1074_v23 = vadd.f32 %v3758_v41, %v3752_v24  ;;  %v909_v25 = vsub.f32 %v3562_v2, %v3704_v57  ;;  %v945_v42 = vmul.f32 1.442695, %v874_v8 }
 0x34b   : > { %v3762_v45 = vpop.eup %2772  ;;  %v1047_v54 = vmul.f32 1.442695, %v925_v51  ;;  %v1049_v15 = vmul.f32 1.442695, %v926_v52  ;;  %v943_v51 = vmul.f32 1.442695, %v873_v14 }
 0x34c   : > { %v3766_v16 = vpop.eup %2774  ;;  %v1015_v39 = vmul.f32 1.442695, %v909_v25 }
 0x34d   : > { %2784 = vpow2.f32 %v1047_v54  ;;  %v1143_v62 = vadd.f32 %v3766_v16, %v3762_v45  ;;  %v3774_v6 = vpop.eup %2776 }
 0x34e   : > { %2786 = vpow2.f32 %v1049_v15  ;;  %v3776_v7 = vpop.eup %2778 }
 0x34f   : > { %1075 = vadd.xlane.f32.xlu0 %v1074_v23  ;;  %1144 = vadd.xlane.f32.xlu1 %v1143_v62  ;;  %v3778_v46 = vpop.eup %2780  ;;  %2788 = vpow2.f32 %v939_v18  ;;  %v912_v23 = vsub.f32 %v3570_v20, %v3710_v58  ;;  %v867_v58 = vsub.f32 %v3416_v55, %v3692_v33 }
 0x350   : > { %v863_v22 = vpop.xlane.xlu2 %862  ;;  %v3784_v21 = vpop.eup %2782  ;;  %2790 = vpow2.f32 %v941_v19 }
 0x351   : > { %v927_v40 = vsub.f32 %v3678_v43, %v863_v22  ;;  %v928_v9 = vsub.f32 %v3680_v29, %v863_v22  ;;  %2792 = vpow2.f32 %v1031_v48  ;;  %v910_v43 = vsub.f32 %v3564_v11, %v3704_v57 }
 0x352   : > { %2794 = vpow2.f32 %v1033_v38  ;;  %v1077_v29 = vadd.f32 %v3776_v7, %v3774_v6  ;;  %v1131_v1 = vadd.f32 %v3784_v21, %v3778_v46  ;;  %v1019_v22 = vmul.f32 1.442695, %v911_v61 }
 0x353   : > { %v3788_v10 = vpop.eup %2784  ;;  %v1051_v34 = vmul.f32 1.442695, %v927_v40  ;;  %v1053_v53 = vmul.f32 1.442695, %v928_v9  ;;  %v1017_v57 = vmul.f32 1.442695, %v910_v43  ;;  %v868_v9 = vsub.f32 %v3418_v56, %v3692_v33 }
 0x354   : > { %v3792_v0 = vpop.eup %2786  ;;  %v1021_v14 = vmul.f32 1.442695, %v912_v23 }
 0x355   : > { %2796 = vpow2.f32 %v1051_v34  ;;  %v1146_v2 = vadd.f32 %v3792_v0, %v3788_v10  ;;  %v3802_v52 = vpop.eup %2788  ;;  %v931_v34 = vmul.f32 1.442695, %v867_v58 }
 0x356   : > { %2798 = vpow2.f32 %v1053_v53  ;;  %v3804_v11 = vpop.eup %2790  ;;  %v933_v53 = vmul.f32 1.442695, %v868_v9 }
 0x357   : > { %1132 = vadd.xlane.f32.xlu0 %v1131_v1  ;;  %1078 = vadd.xlane.f32.xlu1 %v1077_v29  ;;  %v3806_v47 = vpop.eup %2792  ;;  %2800 = vpow2.f32 %v943_v51  ;;  %v1065_v62 = vadd.f32 %v3804_v11, %v3802_v52 }
 0x358   : > { %1147 = vadd.xlane.f32.xlu2 %v1146_v2  ;;  %v3808_v54 = vpop.eup %2794  ;;  %2802 = vpow2.f32 %v945_v42 }
 0x359   : > { %2804 = vpow2.f32 %v1015_v39  ;;  %v1134_v19 = vadd.f32 %v3808_v54, %v3806_v47 }
 0x35a   : > { %2806 = vpow2.f32 %v1017_v57  ;;  %v881_v57 = vsub.f32 %v3458_v12, %v3618_v59 }
 0x35b   : > { %v3810_v15 = vpop.eup %2796  ;;  %2808 = vpow2.f32 %v1019_v22 }
 0x35c   : > { %v3814_v18 = vpop.eup %2798  ;;  %2810 = vpow2.f32 %v1021_v14 }
 0x35d   : > { %v1149_v48 = vadd.f32 %v3814_v18, %v3810_v15  ;;  %v3824_v38 = vpop.eup %2800  ;;  %2812 = vpow2.f32 %v931_v34 }
 0x35e   : > { %v3826_v17 = vpop.eup %2802  ;;  %2814 = vpow2.f32 %v933_v53 }
 0x35f   : > { %1066 = vadd.xlane.f32.xlu0 %v1065_v62  ;;  %1135 = vadd.xlane.f32.xlu1 %v1134_v19  ;;  %v3828_v40 = vpop.eup %2804  ;;  %v1068_v25 = vadd.f32 %v3826_v17, %v3824_v38  ;;  %v882_v62 = vsub.f32 %v3460_v13, %v3618_v59  ;;  %v3860_v19 = vpop.xlane.xlu0 %823  ;;  %v920_v13 = vsub.f32 %v3602_v31, %v3730_v37 }
 0x360   : > { %1150 = vadd.xlane.f32.xlu2 %v1149_v48  ;;  %v3830_v20 = vpop.eup %2806  ;;  %v959_v48 = vmul.f32 1.442695, %v881_v57  ;;  %v876_v31 = vsub.f32 %v3442_v4, %v3670_v49 }
 0x361   : > { %v1122_v8 = vadd.f32 %v3830_v20, %v3828_v40  ;;  %v3840_v43 = vpop.eup %2808  ;;  %v961_v22 = vmul.f32 1.442695, %v882_v62 }
 0x362   : > { %v3842_v29 = vpop.eup %2810 }
 0x363   : > { %v1125_v55 = vadd.f32 %v3842_v29, %v3840_v43  ;;  %v3846_v56 = vpop.eup %2812 }
 0x364   : > { %v3848_v33 = vpop.eup %2814 }
 0x365   : > { %v1059_v51 = vadd.f32 %v3848_v33, %v3846_v56 }
 0x367   : > { %1123 = vadd.xlane.f32.xlu0 %v1122_v8  ;;  %1069 = vadd.xlane.f32.xlu1 %v1068_v25  ;;  %v821_v8 = vpop.xlane.xlu0 %820  ;;  %v1037_v25 = vmul.f32 1.442695, %v920_v13 }
 0x368   : > { %v900_v57 = vsub.f32 %v3524_v63, %v821_v8 }
 0x36a   : > { %v997_v62 = vmul.f32 1.442695, %v900_v57  ;;  %v4941_v57 = vld [vmem:[#allocation40_spill] sm:$0xff] }
 0x36f   : > { %1126 = vadd.xlane.f32.xlu1 %v1125_v55 }
 0x377   : > { %1060 = vadd.xlane.f32.xlu1 %v1059_v51 }
 0x37a   : > { %v3852_v1 = vpop.xlane.xlu2 %1102 }
 0x382   : > { %v866_v2 = vpop.xlane.xlu2 %865 }
 0x383   : > { %v929_v42 = vsub.f32 %v3702_v32, %v866_v2  ;;  %v930_v39 = vsub.f32 %v3706_v44, %v866_v2  ;;  %v919_v32 = vsub.f32 %v3600_v5, %v3730_v37  ;;  %v3870_v44 = vpop.xlane.xlu1 %1099  ;;  %v875_v5 = vsub.f32 %v3440_v3, %v3670_v49 }
 0x384   : > { %v899_v37 = vsub.f32 %v3522_v60, %v821_v8 }
 0x385   : > { %v1055_v61 = vmul.f32 1.442695, %v929_v42  ;;  %v1057_v23 = vmul.f32 1.442695, %v930_v39  ;;  %v1035_v9 = vmul.f32 1.442695, %v919_v32 }
 0x387   : > { %2816 = vpow2.f32 %v1055_v61  ;;  %v947_v61 = vmul.f32 1.442695, %v875_v5 }
 0x388   : > { %2818 = vpow2.f32 %v1057_v23  ;;  %v995_v23 = vmul.f32 1.442695, %v899_v37 }
 0x389   : > { %2820 = vpow2.f32 %v959_v48 }
 0x38a   : > { %v3862_v14 = vpop.xlane.xlu2 %832  ;;  %2822 = vpow2.f32 %v961_v22  ;;  %v4937_v22 = vld [vmem:[#allocation26_spill] sm:$0xff] }
 0x38b   : > { %2824 = vpow2.f32 %v1035_v9  ;;  %v913_v32 = vsub.f32 %v4937_v22, %v3714_v28 }
 0x38c   : > { %2826 = vpow2.f32 %v1037_v25  ;;  %v4938_v25 = vld [vmem:[#allocation27_spill] sm:$0xff] }
 0x38d   : > { %v3864_v58 = vpop.eup %2816  ;;  %v1023_v5 = vmul.f32 1.442695, %v913_v32 }
 0x38e   : > { %v3868_v12 = vpop.eup %2818 }
 0x38f   : > { %v1152_v59 = vadd.f32 %v3868_v12, %v3864_v58  ;;  %v3876_v53 = vpop.eup %2820 }
 0x390   : > { %v3882_v2 = vpop.eup %2822 }
 0x391   : > { %1153 = vadd.xlane.f32.xlu2 %v1152_v59  ;;  %v1080_v3 = vadd.f32 %v3882_v2, %v3876_v53  ;;  %v3890_v49 = vpop.eup %2824 }
 0x392   : > { %v830_v34 = vpop.xlane.xlu2 %829  ;;  %v3894_v48 = vpop.eup %2826 }
 0x393   : > { %v905_v55 = vsub.f32 %v3548_v35, %v830_v34  ;;  %v906_v51 = vsub.f32 %v3550_v36, %v830_v34  ;;  %v949_v35 = vmul.f32 1.442695, %v876_v31  ;;  %v1097_v36 = vpop.xlane.xlu1 %1096  ;;  %v914_v34 = vsub.f32 %v4938_v25, %v3714_v28  ;;  %v4944_v25 = vld [vmem:[#allocation43_spill] sm:$0xff] }
 0x395   : > { %v1007_v42 = vmul.f32 1.442695, %v905_v55  ;;  %v1009_v39 = vmul.f32 1.442695, %v906_v51  ;;  %v1025_v31 = vmul.f32 1.442695, %v914_v34 }
 0x397   : > { %2828 = vpow2.f32 %v1007_v42 }
 0x398   : > { %2830 = vpow2.f32 %v1009_v39 }
 0x399   : > { %1081 = vadd.xlane.f32.xlu2 %v1080_v3  ;;  %2832 = vpow2.f32 %v947_v61  ;;  %v4942_v61 = vld [vmem:[#allocation20_spill] sm:$0xff] }
 0x39a   : > { %v827_v4 = vpop.xlane.xlu2 %826  ;;  %2834 = vpow2.f32 %v949_v35  ;;  %v869_v3 = vsub.f32 %v4942_v61, %v4941_v57  ;;  %v4947_v61 = vld [vmem:[#allocation25_spill] sm:$0xff] }
 0x39b   : > { %v903_v60 = vsub.f32 %v3540_v27, %v827_v4  ;;  %v904_v63 = vsub.f32 %v3542_v30, %v827_v4  ;;  %2836 = vpow2.f32 %v995_v23  ;;  %v1137_v27 = vadd.f32 %v3894_v48, %v3890_v49  ;;  %v1094_v37 = vpop.xlane.xlu1 %1093 }
 0x39c   : > { %2838 = vpow2.f32 %v997_v62  ;;  %v4943_v62 = vld [vmem:[#allocation21_spill] sm:$0xff]  ;;  %v935_v32 = vmul.f32 1.442695, %v869_v3  ;;  %v908_v3 = vsub.f32 %v4947_v61, %v3862_v14 }
 0x39d   : > { %v3898_v13 = vpop.eup %2828  ;;  %v1003_v59 = vmul.f32 1.442695, %v903_v60  ;;  %v1005_v9 = vmul.f32 1.442695, %v904_v63  ;;  %v870_v4 = vsub.f32 %v4943_v62, %v4941_v57  ;;  %v4948_v62 = vld [vmem:[#allocation41_spill] sm:$0xff] }
 0x39e   : > { %v3900_v8 = vpop.eup %2830 }
 0x39f   : > { %2840 = vpow2.f32 %v1003_v59  ;;  %v1116_v30 = vadd.f32 %v3900_v8, %v3898_v13  ;;  %v3908_v55 = vpop.eup %2832 }
 0x3a0   : > { %2842 = vpow2.f32 %v1005_v9  ;;  %v3910_v51 = vpop.eup %2834  ;;  %v937_v9 = vmul.f32 1.442695, %v870_v4 }
 0x3a1   : > { %1138 = vadd.xlane.f32.xlu2 %v1137_v27  ;;  %1117 = vadd.xlane.f32.xlu0 %v1116_v30  ;;  %v3912_v39 = vpop.eup %2836  ;;  %v1071_v60 = vadd.f32 %v3910_v51, %v3908_v55  ;;  %v4945_v27 = vld [vmem:[#allocation44_spill] sm:$0xff] }
 0x3a2   : > { %v1106_v42 = vpop.xlane.xlu2 %1105  ;;  %4939 = vst [vmem:[#allocation26_spill] sm:$0xff] %v3912_v39  ;;  %v3914_v28 = vpop.eup %2838 }
 0x3a3   : > { %2844 = vrcp.f32 %v1106_v42  ;;  %4940 = vst [vmem:[#allocation27_spill] sm:$0xff] %v3914_v28  ;;  %v1107_v63 = vadd.f32 %v3914_v28, %v3912_v39  ;;  %v1091_v42 = vpop.xlane.xlu1 %1090 }
 0x3a4   : > { %2846 = vpow2.f32 %v1023_v5 }
 0x3a5   : > { %v3918_v35 = vpop.eup %2840  ;;  %2848 = vrcp.f32 %v3852_v1 }
 0x3a6   : > { %v3921_v23 = vpop.eup %2842  ;;  %2850 = vpow2.f32 %v1025_v31 }
 0x3a7   : > { %v1113_v22 = vadd.f32 %v3921_v23, %v3918_v35  ;;  %2852 = vrcp.f32 %v3870_v44  ;;  %v4946_v44 = vld [vmem:[#allocation24_spill] sm:$0xff] }
 0x3a8   : > { %2854 = vpow2.f32 %v935_v32  ;;  %v907_v57 = vsub.f32 %v4946_v44, %v3862_v14 }
 0x3a9   : > { %v2845_v59 = vpop.eup %2844  ;;  %1072 = vadd.xlane.f32.xlu2 %v1071_v60  ;;  %1108 = vadd.xlane.f32.xlu0 %v1107_v63  ;;  %2856 = vrcp.f32 %v1097_v36  ;;  %v4949_v60 = vld [vmem:[#allocation42_spill] sm:$0xff] }
 0x3aa   : > { %v3932_v1 = vpop.eup %2846  ;;  %1114 = vadd.xlane.f32.xlu1 %v1113_v22  ;;  %v1217_v34 = vmul.f32 %v2845_v59, %v4944_v25  ;;  %v1218_v30 = vmul.f32 %v2845_v59, %v4945_v27  ;;  %2858 = vpow2.f32 %v937_v9  ;;  %v1011_v32 = vmul.f32 1.442695, %v907_v57  ;;  %v4950_v9 = vld [vmem:[#allocation28_spill] sm:$0xff]  ;;  %v4951_v27 = vld [vmem:[#allocation29_spill] sm:$0xff] }
 0x3ab   : > { %v2849_v5 = vpop.eup %2848  ;;  %2860 = vrcp.f32 %v1094_v37  ;;  %v1013_v25 = vmul.f32 1.442695, %v908_v3  ;;  %v4953_v37 = vld [vmem:[#allocation23_spill] sm:$0xff]  ;;  %v4954_v3 = vld [vmem:[#allocation30_spill] sm:$0xff] }
 0x3ac   : > { %v3936_v31 = vpop.eup %2850  ;;  %1251 = vmatpush.xpose.msrb.mxu0 %v1217_v34  ;;  %1274 = vmatpush.xpose.msrb.mxu1 %v1218_v30  ;;  %v1215_v4 = vmul.f32 %v2849_v5, %v4948_v62  ;;  %v1216_v63 = vmul.f32 %v2849_v5, %v4949_v60  ;;  %v4952_v5 = vld [vmem:[#allocation22_spill] sm:$0xff]  ;;  %2862 = vrcp.f32 %v1091_v42  ;;  %v902_v57 = vsub.f32 %v4953_v37, %v3860_v19  ;;  %v1088_v62 = vpop.xlane.xlu1 %1087  ;;  %v4955_v60 = vld [vmem:[#allocation31_spill] sm:$0xff] }
 0x3ad   : > { %v2853_v22 = vpop.eup %2852  ;;  %v1128_v59 = vadd.f32 %v3936_v31, %v3932_v1  ;;  %v901_v61 = vsub.f32 %v4952_v5, %v3860_v19  ;;  %2864 = vpow2.f32 %v1011_v32 }
 0x3ae   : > { %v3946_v36 = vpop.eup %2854  ;;  %v1213_v34 = vmul.f32 %v2853_v22, %v4950_v9  ;;  %v1214_v14 = vmul.f32 %v2853_v22, %v4951_v27  ;;  %2866 = vpow2.f32 %v1013_v25  ;;  %v1001_v32 = vmul.f32 1.442695, %v902_v57  ;;  %v4956_v27 = vld [vmem:[#allocation34_spill] sm:$0xff] }
 0x3af   : > { %v2857_v30 = vpop.eup %2856  ;;  %v999_v9 = vmul.f32 1.442695, %v901_v61  ;;  %2868 = vrcp.f32 %v1088_v62  ;;  %v4959_v62 = vld [vmem:[#allocation37_spill] sm:$0xff] }
 0x3b0   : > { %1252 = vmatpush.xpose.msrb.mxu0 %v1215_v4  ;;  %1275 = vmatpush.xpose.msrb.mxu1 %v1216_v63  ;;  %v3950_v44 = vpop.eup %2858  ;;  %v1211_v4 = vmul.f32 %v2857_v30, %v4954_v3  ;;  %v1212_v63 = vmul.f32 %v2857_v30, %v4955_v60  ;;  %v4958_v30 = vld [vmem:[#allocation36_spill] sm:$0xff] }
 0x3b1   : > { %1129 = vadd.xlane.f32.xlu2 %v1128_v59  ;;  %v2861_v22 = vpop.eup %2860  ;;  %v1062_v59 = vadd.f32 %v3950_v44, %v3946_v36  ;;  %2870 = vpow2.f32 %v999_v9 }
 0x3b2   : > { %v2863_v42 = vpop.eup %2862  ;;  %v1209_v19 = vmul.f32 %v2861_v22, %v4956_v27 }
 0x3b3   : > { %v3962_v5 = vpop.eup %2864  ;;  %v1207_v61 = vmul.f32 %v2863_v42, %v4958_v30  ;;  %v1208_v3 = vmul.f32 %v2863_v42, %v4959_v62  ;;  %v227_v30 = vld [vmem:[%s4827_s1 + $0x30] sm:$0xff]  ;;  %v4964_v62 = vld [vmem:[#allocation8_spill] sm:$0xff] }
 0x3b4   : > { %1253 = vmatpush.xpose.msrb.mxu0 %v1213_v34  ;;  %1276 = vmatpush.xpose.msrb.mxu1 %v1214_v14  ;;  %v1085_v34 = vpop.xlane.xlu0 %1084  ;;  %v4957_v14 = vld [vmem:[#allocation35_spill] sm:$0xff]  ;;  %v3964_v37 = vpop.eup %2866 }
 0x3b5   : > { %v1210_v25 = vmul.f32 %v2861_v22, %v4957_v14  ;;  %2872 = vrcp.f32 %v1085_v34  ;;  %v1119_v57 = vadd.f32 %v3964_v37, %v3962_v5  ;;  %2504 = vmatmul.msk.f32.gmra.mxu0 %vm241_vm0, %v227_v30  ;;  %2516 = vmatmul.msk.f32.gmra.mxu1 %vm241_vm0, %v227_v30 }
 0x3b6   : > { %2874 = vpow2.f32 %v1001_v32  ;;  %v4962_v32 = vld [vmem:[#allocation32_spill] sm:$0xff] }
 0x3b8   : > { %1254 = vmatpush.xpose.msrb.mxu0 %v1211_v4  ;;  %1277 = vmatpush.xpose.msrb.mxu1 %v1212_v63  ;;  %v2869_v4 = vpop.eup %2868  ;;  %v4960_v63 = vld [vmem:[#allocation38_spill] sm:$0xff] }
 0x3b9   : > { %1063 = vadd.xlane.f32.xlu2 %v1062_v59  ;;  %v3970_v60 = vpop.eup %2870  ;;  %v1205_v22 = vmul.f32 %v2869_v4, %v4960_v63  ;;  %v4961_v59 = vld [vmem:[#allocation39_spill] sm:$0xff] }
 0x3ba   : > { %v1206_v9 = vmul.f32 %v2869_v4, %v4961_v59 }
 0x3bb   : > { %v2873_v27 = vpop.eup %2872 }
 0x3bc   : > { %1255 = vmatpush.xpose.msrb.mxu0 %v1209_v19  ;;  %1278 = vmatpush.xpose.msrb.mxu1 %v1210_v25  ;;  %v3974_v34 = vpop.eup %2874  ;;  %v1203_v42 = vmul.f32 %v2873_v27, %v4962_v32  ;;  %v4963_v19 = vld [vmem:[#allocation33_spill] sm:$0xff] }
 0x3bd   : > { %v1204_v14 = vmul.f32 %v2873_v27, %v4963_v19  ;;  %v1110_v25 = vadd.f32 %v3974_v34, %v3970_v60 }
 0x3c0   : > { %1256 = vmatpush.xpose.msrb.mxu0 %v1207_v61  ;;  %1279 = vmatpush.xpose.msrb.mxu1 %v1208_v3  ;;  %v228_v61 = vld [vmem:[%s4827_s1 + $0x38] sm:$0xff]  ;;  %v4965_v3 = vld [vmem:[#allocation10_spill] sm:$0xff] }
 0x3c1   : > { %1120 = vadd.xlane.f32.xlu2 %v1119_v57  ;;  %2505 = vmatmul.msk.f32.gmra.mxu0 %vm241_vm0, %v228_v61  ;;  %v4966_v57 = vld [vmem:[#allocation9_spill] sm:$0xff] }
 0x3c2   : > { %2517 = vmatmul.msk.f32.gmra.mxu1 %vm241_vm0, %v228_v61  ;;  %v3995_v63 = vpop.xlane.xlu1 %1144 }
 0x3c4   : > { %1257 = vmatpush.xpose.msrb.mxu0 %v1205_v22  ;;  %1280 = vmatpush.xpose.msrb.mxu1 %v1206_v9  ;;  %v4967_v22 = vld [vmem:[#allocation11_spill] sm:$0xff]  ;;  %v3998_v9 = vpop.xlane.xlu0 %1141 }
 0x3c8   : > { %1258 = vmatpush.xpose.msrb.mxu0 %v1203_v42  ;;  %1281 = vmatpush.xpose.msrb.mxu1 %v1204_v14 }
 0x3c9   : > { %1111 = vadd.xlane.f32.xlu2 %v1110_v25 }
 0x3ca   : > { %v1079_v27 = vpop.xlane.xlu1 %1078 }
 0x3cb   : > { %v3992_v4 = vpop.xlane.xlu2 %1147 }
 0x3cc   : > { %v1076_v19 = vpop.xlane.xlu0 %1075 }
 0x3d2   : > { %v4000_v14 = vpop.xlane.xlu1 %1135 }
 0x3d3   : > { %v1151_v59 = vpop.xlane.xlu2 %1150 }
 0x3e4   : > { %1343 = vxpose.xlu1.b32.start [1/2] (short) %v4964_v62, 128 }
 0x3ec   : > { %1344 = vxpose.xlu1.b32.end [2/2] (short) %v4965_v3, 128 }
 0x3f2   : > { %1375 = vxpose.xlu2.b32.start [1/2] (short) %v4966_v57, 128  ;;  %v4006_v57 = vpop.xlane.xlu0 %1132 }
 0x3fa   : > { %1376 = vxpose.xlu2.b32.end [2/2] (short) %v4967_v22, 128  ;;  %v1070_v22 = vpop.xlane.xlu1 %1069 }
 0x404   : > { %v1154_v32 = vpop.xlane.xlu2 %1153 }
 0x40c   : > { %v1082_v42 = vpop.xlane.xlu2 %1081 }
 0x40d   : > { %2876 = vrcp.f32 %v1082_v42 }
 0x40e   : > { %2878 = vrcp.f32 %v1079_v27 }
 0x40f   : > { %2880 = vrcp.f32 %v1076_v19 }
 0x413   : > { %v2877_v25 = vpop.eup %2876 }
 0x414   : > { %v4002_v30 = vpop.xlane.xlu2 %1138  ;;  %v1201_v61 = vmul.f32 %v2877_v25, %v3876_v53  ;;  %v1202_v62 = vmul.f32 %v2877_v25, %v3882_v2  ;;  %v2879_v3 = vpop.eup %2878 }
 0x415   : > { %v1199_v42 = vmul.f32 %v2879_v3, %v3774_v6  ;;  %v1200_v28 = vmul.f32 %v2879_v3, %v3776_v7  ;;  %v2881_v39 = vpop.eup %2880  ;;  %v1067_v2 = vpop.xlane.xlu0 %1066 }
 0x416   : > { %1259 = vmatpush.xpose.msrb.mxu0 %v1201_v61  ;;  %1282 = vmatpush.xpose.msrb.mxu1 %v1202_v62  ;;  %v1197_v19 = vmul.f32 %v2881_v39, %v3752_v24  ;;  %v1198_v53 = vmul.f32 %v2881_v39, %v3758_v41  ;;  %v4012_v25 = vpop.xlane.xlu1 %1126 }
 0x41a   : > { %1260 = vmatpush.xpose.msrb.mxu0 %v1199_v42  ;;  %1283 = vmatpush.xpose.msrb.mxu1 %v1200_v28 }
 0x41c   : > { %v1073_v27 = vpop.xlane.xlu2 %1072 }
 0x41d   : > { %2882 = vrcp.f32 %v1073_v27 }
 0x41e   : > { %1261 = vmatpush.xpose.msrb.mxu0 %v1197_v19  ;;  %1284 = vmatpush.xpose.msrb.mxu1 %v1198_v53  ;;  %2884 = vrcp.f32 %v1070_v22  ;;  %v1061_v3 = vpop.xlane.xlu1 %1060 }
 0x41f   : > { %2886 = vrcp.f32 %v1067_v2 }
 0x423   : > { %v2883_v6 = vpop.eup %2882 }
 0x424   : > { %v4014_v61 = vpop.xlane.xlu2 %1129  ;;  %v1195_v7 = vmul.f32 %v2883_v6, %v3908_v55  ;;  %v1196_v28 = vmul.f32 %v2883_v6, %v3910_v51  ;;  %v2885_v62 = vpop.eup %2884  ;;  %v4971_v6 = vld [vmem:[#allocation15_spill] sm:$0xff] }
 0x425   : > { %v1193_v24 = vmul.f32 %v2885_v62, %v3824_v38  ;;  %v1194_v41 = vmul.f32 %v2885_v62, %v3826_v17  ;;  %v2887_v39 = vpop.eup %2886 }
 0x426   : > { %1262 = vmatpush.xpose.msrb.mxu0 %v1195_v7  ;;  %1285 = vmatpush.xpose.msrb.mxu1 %v1196_v28  ;;  %v1191_v42 = vmul.f32 %v2887_v39, %v3802_v52  ;;  %v1192_v27 = vmul.f32 %v2887_v39, %v3804_v11 }
 0x42a   : > { %1263 = vmatpush.xpose.msrb.mxu0 %v1193_v24  ;;  %1286 = vmatpush.xpose.msrb.mxu1 %v1194_v41 }
 0x42c   : > { %v1064_v22 = vpop.xlane.xlu2 %1063 }
 0x42d   : > { %2888 = vrcp.f32 %v1064_v22 }
 0x42e   : > { %2890 = vrcp.f32 %v1061_v3  ;;  %1264 = vmatpush.xpose.msrb.mxu0 %v1191_v42  ;;  %1287 = vmatpush.xpose.msrb.mxu1 %v1192_v27 }
 0x42f   : > { %2892 = vrcp.f32 %v1154_v32 }
 0x430   : > { %2894 = vrcp.f32 %v1151_v59 }
 0x431   : > { %2896 = vrcp.f32 %v3992_v4 }
 0x432   : > { %2898 = vrcp.f32 %v3995_v63  ;;  %v4970_v63 = vld [vmem:[#allocation14_spill] sm:$0xff] }
 0x433   : > { %v2889_v55 = vpop.eup %2888  ;;  %2900 = vrcp.f32 %v3998_v9 }
 0x434   : > { %v1189_v38 = vmul.f32 %v2889_v55, %v3946_v36  ;;  %v1190_v17 = vmul.f32 %v2889_v55, %v3950_v44  ;;  %v2891_v51 = vpop.eup %2890  ;;  %v4968_v36 = vld [vmem:[#allocation12_spill] sm:$0xff]  ;;  %v4969_v44 = vld [vmem:[#allocation13_spill] sm:$0xff]  ;;  %2902 = vrcp.f32 %v4002_v30  ;;  %v1121_v62 = vpop.xlane.xlu2 %1120 }
 0x435   : > { %v2893_v19 = vpop.eup %2892  ;;  %v1187_v52 = vmul.f32 %v2891_v51, %v3846_v56  ;;  %v1188_v11 = vmul.f32 %v2891_v51, %v3848_v33  ;;  %2904 = vrcp.f32 %v4000_v14 }
 0x436   : > { %1265 = vmatpush.xpose.msrb.mxu0 %v1189_v38  ;;  %1288 = vmatpush.xpose.msrb.mxu1 %v1190_v17  ;;  %v1249_v32 = vmul.f32 %v2893_v19, %v3864_v58  ;;  %v1250_v53 = vmul.f32 %v2893_v19, %v3868_v12  ;;  %v2895_v2 = vpop.eup %2894  ;;  %2906 = vrcp.f32 %v4006_v57  ;;  %v366_v38 = vpop.f32.mrf.mxu1 }
 0x437   : > { %v1247_v4 = vmul.f32 %v2895_v2, %v3810_v15  ;;  %v1248_v56 = vmul.f32 %v2895_v2, %v3814_v18  ;;  %v2897_v33 = vpop.eup %2896  ;;  %2908 = vrcp.f32 %v4014_v61 }
 0x438   : > { %v1245_v58 = vmul.f32 %v2897_v33, %v3788_v10  ;;  %v1246_v12 = vmul.f32 %v2897_v33, %v3792_v0  ;;  %v2899_v59 = vpop.eup %2898  ;;  %2910 = vrcp.f32 %v4012_v25 }
 0x439   : > { %v1243_v15 = vmul.f32 %v2899_v59, %v3762_v45  ;;  %v1244_v18 = vmul.f32 %v2899_v59, %v3766_v16  ;;  %v2901_v7 = vpop.eup %2900 }
 0x43a   : > { %1266 = vmatpush.xpose.msrb.mxu0 %v1187_v52  ;;  %1289 = vmatpush.xpose.msrb.mxu1 %v1188_v11  ;;  %v1241_v10 = vmul.f32 %v2901_v7, %v3744_v26  ;;  %v1242_v0 = vmul.f32 %v2901_v7, %v3747_v50  ;;  %v2903_v9 = vpop.eup %2902  ;;  %v1124_v50 = vpop.xlane.xlu0 %1123  ;;  %v4973_v11 = vld [vmem:[#allocation27_spill] sm:$0xff] }
 0x43b   : > { %v1239_v30 = vmul.f32 %v2903_v9, %v3890_v49  ;;  %v1240_v45 = vmul.f32 %v2903_v9, %v3894_v48  ;;  %v2905_v28 = vpop.eup %2904  ;;  %2912 = vrcp.f32 %v1124_v50 }
 0x43c   : > { %v1237_v16 = vmul.f32 %v2905_v28, %v3806_v47  ;;  %v1238_v26 = vmul.f32 %v2905_v28, %v3808_v54  ;;  %v2907_v14 = vpop.eup %2906  ;;  %2914 = vrcp.f32 %v1121_v62 }
 0x43d   : > { %1267 = vmatmul.f32.vlgmr.msrb.gmra.mxu0 %v4968_v36  ;;  %1290 = vmatmul.f32.vlgmr.msrb.gmra.mxu1 %v4969_v44  ;;  %v1235_v57 = vmul.f32 %v2907_v14, %v3778_v46  ;;  %v1236_v49 = vmul.f32 %v2907_v14, %v3784_v21  ;;  %v2909_v48 = vpop.eup %2908  ;;  %v1115_v21 = vpop.xlane.xlu1 %1114 }
 0x43e   : > { %1297 = vmatpush.xpose.msra.mxu0 %v1249_v32  ;;  %1320 = vmatpush.xpose.msra.mxu1 %v1250_v53  ;;  %v1233_v61 = vmul.f32 %v2909_v48, %v3932_v1  ;;  %v1234_v47 = vmul.f32 %v2909_v48, %v3936_v31  ;;  %v2911_v54 = vpop.eup %2910  ;;  %v1112_v31 = vpop.xlane.xlu2 %1111 }
 0x43f   : > { %v1231_v25 = vmul.f32 %v2911_v54, %v3840_v43  ;;  %v1232_v46 = vmul.f32 %v2911_v54, %v3842_v29  ;;  %v369_v2 = vpop.f32.mrf.mxu1 }
 0x441   : > { %v2913_v41 = vpop.eup %2912 }
 0x442   : > { %1298 = vmatpush.xpose.msra.mxu0 %v1247_v4  ;;  %1321 = vmatpush.xpose.msra.mxu1 %v1248_v56  ;;  %v1118_v24 = vpop.xlane.xlu0 %1117  ;;  %v1229_v39 = vmul.f32 %v2913_v41, %v3828_v40  ;;  %v1230_v1 = vmul.f32 %v2913_v41, %v3830_v20  ;;  %v2915_v3 = vpop.eup %2914 }
 0x443   : > { %2916 = vrcp.f32 %v1118_v24  ;;  %v1227_v22 = vmul.f32 %v2915_v3, %v3962_v5  ;;  %v1228_v43 = vmul.f32 %v2915_v3, %v3964_v37  ;;  %v313_v20 = vpop.f32.mrf.mxu0 }
 0x444   : > { %2918 = vrcp.f32 %v1115_v21 }
 0x445   : > { %1270 = vmatmul.f32.gmra.mxu0 %v4970_v63  ;;  %1293 = vmatmul.f32.gmra.mxu1 %v4971_v6  ;;  %2920 = vrcp.f32 %v1112_v31 }
 0x446   : > { %1299 = vmatpush.xpose.msra.mxu0 %v1245_v58  ;;  %1322 = vmatpush.xpose.msra.mxu1 %v1246_v12 }
 0x449   : > { %v2917_v42 = vpop.eup %2916 }
 0x44a   : > { %1300 = vmatpush.xpose.msra.mxu0 %v1243_v15  ;;  %1323 = vmatpush.xpose.msra.mxu1 %v1244_v18  ;;  %v1109_v29 = vpop.xlane.xlu0 %1108  ;;  %v1225_v27 = vmul.f32 %v2917_v42, %v3898_v13  ;;  %v1226_v40 = vmul.f32 %v2917_v42, %v3900_v8  ;;  %v2919_v55 = vpop.eup %2918  ;;  %v4972_v8 = vld [vmem:[#allocation26_spill] sm:$0xff] }
 0x44b   : > { %2922 = vrcp.f32 %v1109_v29  ;;  %v1223_v17 = vmul.f32 %v2919_v55, %v3918_v35  ;;  %v1224_v5 = vmul.f32 %v2919_v55, %v3921_v23  ;;  %v2921_v37 = vpop.eup %2920  ;;  %v316_v53 = vpop.f32.mrf.mxu0 }
 0x44c   : > { %v1221_v51 = vmul.f32 %v2921_v37, %v3970_v60  ;;  %v1222_v19 = vmul.f32 %v2921_v37, %v3974_v34 }
 0x44e   : > { %1301 = vmatpush.xpose.msra.mxu0 %v1241_v10  ;;  %1324 = vmatpush.xpose.msra.mxu1 %v1242_v0 }
 0x451   : > { %v2923_v13 = vpop.eup %2922 }
 0x452   : > { %1302 = vmatpush.xpose.msra.mxu0 %v1239_v30  ;;  %1325 = vmatpush.xpose.msra.mxu1 %v1240_v45  ;;  %v1219_v52 = vmul.f32 %v2923_v13, %v4972_v8  ;;  %v1220_v32 = vmul.f32 %v2923_v13, %v4973_v11 }
 0x456   : > { %1303 = vmatpush.xpose.msra.mxu0 %v1237_v16  ;;  %1326 = vmatpush.xpose.msra.mxu1 %v1238_v26 }
 0x45a   : > { %1304 = vmatpush.xpose.msra.mxu0 %v1235_v57  ;;  %1327 = vmatpush.xpose.msra.mxu1 %v1236_v49 }
 0x45e   : > { %1305 = vmatpush.xpose.msra.mxu0 %v1233_v61  ;;  %1328 = vmatpush.xpose.msra.mxu1 %v1234_v47 }
 0x462   : > { %1306 = vmatpush.xpose.msra.mxu0 %v1231_v25  ;;  %1329 = vmatpush.xpose.msra.mxu1 %v1232_v46 }
 0x466   : > { %1307 = vmatpush.xpose.msra.mxu0 %v1229_v39  ;;  %1330 = vmatpush.xpose.msra.mxu1 %v1230_v1 }
 0x46a   : > { %1308 = vmatpush.xpose.msra.mxu0 %v1227_v22  ;;  %1331 = vmatpush.xpose.msra.mxu1 %v1228_v43 }
 0x46e   : > { %1309 = vmatpush.xpose.msra.mxu0 %v1225_v27  ;;  %1332 = vmatpush.xpose.msra.mxu1 %v1226_v40 }
 0x472   : > { %1310 = vmatpush.xpose.msra.mxu0 %v1223_v17  ;;  %1333 = vmatpush.xpose.msra.mxu1 %v1224_v5 }
 0x476   : > { %1311 = vmatpush.xpose.msra.mxu0 %v1221_v51  ;;  %1334 = vmatpush.xpose.msra.mxu1 %v1222_v19 }
 0x47a   : > { %1312 = vmatpush.xpose.msra.mxu0 %v1219_v52  ;;  %1335 = vmatpush.xpose.msra.mxu1 %v1220_v32 }
 0x47d   : > { %1313 = vmatmul.f32.vlgmr.msra.gmra.mxu0 %v4968_v36  ;;  %1336 = vmatmul.f32.vlgmr.msra.gmra.mxu1 %v4969_v44 }
 0x47e   : > { %1517 = vmatpush.msrb.mxu0 %v316_v53  ;;  %1630 = vmatpush.msrb.mxu1 %v369_v2 }
 0x480   : > { %1518 = vmatpush.msrb.mxu0 %v313_v20  ;;  %1631 = vmatpush.msrb.mxu1 %v366_v38 }
 0x485   : > { %1316 = vmatmul.f32.gmra.mxu0 %v4970_v63  ;;  %1339 = vmatmul.f32.gmra.mxu1 %v4971_v6 }
 0x488   : > { %v1359_v35 = vpop.trf.xlu1 }
 0x48b   : > { %v1391_v18 = vpop.trf.xlu2 }
 0x48d   : > { %2586 = vmatmul.msk.f32.vlgmr.msrb.gmra.mxu0 %vm448_vm1, %v1359_v35  ;;  %2618 = vmatmul.msk.f32.vlgmr.msrb.gmra.mxu1 %vm448_vm1, %v1359_v35 }
 0x490   : > { %v1360_v23 = vpop.trf.xlu1 }
 0x493   : > { %v1392_v9 = vpop.trf.xlu2 }
 0x495   : > { %2587 = vmatmul.msk.f32.gmra.mxu0 %vm448_vm1, %v1360_v23  ;;  %2619 = vmatmul.msk.f32.gmra.mxu1 %vm448_vm1, %v1360_v23 }
 0x498   : > { %v1361_v60 = vpop.trf.xlu1 }
 0x49b   : > { %v1393_v50 = vpop.trf.xlu2 }
 0x49d   : > { %2588 = vmatmul.msk.f32.gmra.mxu0 %vm448_vm1, %v1361_v60  ;;  %2620 = vmatmul.msk.f32.gmra.mxu1 %vm448_vm1, %v1361_v60 }
 0x4a0   : > { %v1362_v34 = vpop.trf.xlu1 }
 0x4a3   : > { %v1394_v48 = vpop.trf.xlu2 }
 0x4a5   : > { %2589 = vmatmul.msk.f32.gmra.mxu0 %vm448_vm1, %v1362_v34  ;;  %2621 = vmatmul.msk.f32.gmra.mxu1 %vm448_vm1, %v1362_v34 }
 0x4a8   : > { %v1363_v36 = vpop.trf.xlu1 }
 0x4ab   : > { %v1395_v47 = vpop.trf.xlu2 }
 0x4ad   : > { %2590 = vmatmul.msk.f32.gmra.mxu0 %vm448_vm1, %v1363_v36  ;;  %2622 = vmatmul.msk.f32.gmra.mxu1 %vm448_vm1, %v1363_v36 }
 0x4b0   : > { %v1364_v44 = vpop.trf.xlu1 }
 0x4b3   : > { %v1396_v25 = vpop.trf.xlu2 }
 0x4b5   : > { %2591 = vmatmul.msk.f32.gmra.mxu0 %vm448_vm1, %v1364_v44  ;;  %2623 = vmatmul.msk.f32.gmra.mxu1 %vm448_vm1, %v1364_v44 }
 0x4b8   : > { %v1365_v4 = vpop.trf.xlu1 }
 0x4ba   : > { %v4098_v63 = vpop.f32.mrf.mxu0  ;;  %v4100_v6 = vpop.f32.mrf.mxu1 }
 0x4bb   : > { %4974 = vst [vmem:[#allocation40_spill] sm:$0xff] %v4098_v63  ;;  %v1397_v1 = vpop.trf.xlu2 }
 0x4bc   : > { %4975 = vst [vmem:[#allocation20_spill] sm:$0xff] %v4100_v6 }
 0x4bd   : > { %2592 = vmatmul.msk.f32.gmra.mxu0 %vm448_vm1, %v1365_v4  ;;  %2624 = vmatmul.msk.f32.gmra.mxu1 %vm448_vm1, %v1365_v4 }
 0x4c0   : > { %v1366_v56 = vpop.trf.xlu1 }
 0x4c2   : > { %v4104_v7 = vpop.f32.mrf.mxu0  ;;  %v4106_v10 = vpop.f32.mrf.mxu1 }
 0x4c3   : > { %4976 = vst [vmem:[#allocation21_spill] sm:$0xff] %v4104_v7  ;;  %v1398_v22 = vpop.trf.xlu2 }
 0x4c4   : > { %4977 = vst [vmem:[#allocation43_spill] sm:$0xff] %v4106_v10 }
 0x4c5   : > { %2593 = vmatmul.msk.f32.gmra.mxu0 %vm448_vm1, %v1366_v56  ;;  %2625 = vmatmul.msk.f32.gmra.mxu1 %vm448_vm1, %v1366_v56 }
 0x4c8   : > { %v1367_v33 = vpop.trf.xlu1 }
 0x4cb   : > { %v1399_v29 = vpop.trf.xlu2 }
 0x4cd   : > { %2594 = vmatmul.msk.f32.gmra.mxu0 %vm448_vm1, %v1367_v33  ;;  %2626 = vmatmul.msk.f32.gmra.mxu1 %vm448_vm1, %v1367_v33 }
 0x4d0   : > { %v1368_v58 = vpop.trf.xlu1 }
 0x4d3   : > { %v1400_v55 = vpop.trf.xlu2 }
 0x4d5   : > { %2595 = vmatmul.msk.f32.gmra.mxu0 %vm448_vm1, %v1368_v58  ;;  %2627 = vmatmul.msk.f32.gmra.mxu1 %vm448_vm1, %v1368_v58 }
 0x4d8   : > { %v1369_v12 = vpop.trf.xlu1 }
 0x4db   : > { %v1401_v51 = vpop.trf.xlu2 }
 0x4dd   : > { %2596 = vmatmul.msk.f32.gmra.mxu0 %vm448_vm1, %v1369_v12  ;;  %2628 = vmatmul.msk.f32.gmra.mxu1 %vm448_vm1, %v1369_v12 }
 0x4e0   : > { %v1370_v59 = vpop.trf.xlu1 }
 0x4e3   : > { %v1402_v52 = vpop.trf.xlu2 }
 0x4e5   : > { %2597 = vmatmul.msk.f32.gmra.mxu0 %vm448_vm1, %v1370_v59  ;;  %2629 = vmatmul.msk.f32.gmra.mxu1 %vm448_vm1, %v1370_v59 }
 0x4e8   : > { %v1371_v15 = vpop.trf.xlu1 }
 0x4eb   : > { %v1403_v2 = vpop.trf.xlu2 }
 0x4ed   : > { %2598 = vmatmul.msk.f32.gmra.mxu0 %vm448_vm1, %v1371_v15  ;;  %2630 = vmatmul.msk.f32.gmra.mxu1 %vm448_vm1, %v1371_v15 }
 0x4f0   : > { %v1372_v0 = vpop.trf.xlu1 }
 0x4f3   : > { %v1404_v34 = vpop.trf.xlu2 }
 0x4f5   : > { %2599 = vmatmul.msk.f32.gmra.mxu0 %vm448_vm1, %v1372_v0  ;;  %2631 = vmatmul.msk.f32.gmra.mxu1 %vm448_vm1, %v1372_v0 }
 0x4f8   : > { %v1373_v28 = vpop.trf.xlu1 }
 0x4fa   : > { %v4110_v30 = vpop.f32.mrf.mxu0  ;;  %v4112_v45 = vpop.f32.mrf.mxu1 }
 0x4fb   : > { %4978 = vst [vmem:[#allocation44_spill] sm:$0xff] %v4110_v30  ;;  %v1405_v56 = vpop.trf.xlu2 }
 0x4fc   : > { %4979 = vst [vmem:[#allocation24_spill] sm:$0xff] %v4112_v45 }
 0x4fd   : > { %2600 = vmatmul.msk.f32.gmra.mxu0 %vm448_vm1, %v1373_v28  ;;  %2632 = vmatmul.msk.f32.gmra.mxu1 %vm448_vm1, %v1373_v28 }
 0x500   : > { %v1374_v14 = vpop.trf.xlu1 }
 0x502   : > { %v4116_v16 = vpop.f32.mrf.mxu0  ;;  %v4118_v26 = vpop.f32.mrf.mxu1 }
 0x503   : > { %4980 = vst [vmem:[#allocation25_spill] sm:$0xff] %v4116_v16 }
 0x504   : > { %4981 = vst [vmem:[#allocation41_spill] sm:$0xff] %v4118_v26 }
 0x505   : > { %2601 = vmatmul.msk.f32.gmra.mxu0 %vm448_vm1, %v1374_v14  ;;  %2633 = vmatmul.msk.f32.gmra.mxu1 %vm448_vm1, %v1374_v14 }
 0x50a   : > { %v4122_v57 = vpop.f32.mrf.mxu0  ;;  %v4124_v49 = vpop.f32.mrf.mxu1 }
 0x50d   : > { %2602 = vmatmul.msk.f32.gmra.mxu0 %vm448_vm1, %v1391_v18  ;;  %2634 = vmatmul.msk.f32.gmra.mxu1 %vm448_vm1, %v1391_v18 }
 0x512   : > { %v4128_v62 = vpop.f32.mrf.mxu0  ;;  %v4130_v61 = vpop.f32.mrf.mxu1 }
 0x515   : > { %2603 = vmatmul.msk.f32.gmra.mxu0 %vm448_vm1, %v1392_v9  ;;  %2635 = vmatmul.msk.f32.gmra.mxu1 %vm448_vm1, %v1392_v9 }
 0x51a   : > { %v4134_v54 = vpop.f32.mrf.mxu0  ;;  %v4136_v24 = vpop.f32.mrf.mxu1 }
 0x51d   : > { %2604 = vmatmul.msk.f32.gmra.mxu0 %vm448_vm1, %v1393_v50  ;;  %2636 = vmatmul.msk.f32.gmra.mxu1 %vm448_vm1, %v1393_v50 }
 0x522   : > { %v4140_v46 = vpop.f32.mrf.mxu0  ;;  %v4142_v41 = vpop.f32.mrf.mxu1 }
 0x525   : > { %2605 = vmatmul.msk.f32.gmra.mxu0 %vm448_vm1, %v1394_v48  ;;  %2637 = vmatmul.msk.f32.gmra.mxu1 %vm448_vm1, %v1394_v48 }
 0x52a   : > { %v4146_v21 = vpop.f32.mrf.mxu0  ;;  %v4148_v39 = vpop.f32.mrf.mxu1 }
 0x52d   : > { %2606 = vmatmul.msk.f32.gmra.mxu0 %vm448_vm1, %v1395_v47  ;;  %2638 = vmatmul.msk.f32.gmra.mxu1 %vm448_vm1, %v1395_v47 }
 0x532   : > { %v4152_v3 = vpop.f32.mrf.mxu0  ;;  %v4154_v31 = vpop.f32.mrf.mxu1 }
 0x535   : > { %2607 = vmatmul.msk.f32.gmra.mxu0 %vm448_vm1, %v1396_v25  ;;  %2639 = vmatmul.msk.f32.gmra.mxu1 %vm448_vm1, %v1396_v25 }
 0x53a   : > { %v4158_v43 = vpop.f32.mrf.mxu0  ;;  %v4160_v42 = vpop.f32.mrf.mxu1 }
 0x53d   : > { %2608 = vmatmul.msk.f32.gmra.mxu0 %vm448_vm1, %v1397_v1  ;;  %2640 = vmatmul.msk.f32.gmra.mxu1 %vm448_vm1, %v1397_v1 }
 0x542   : > { %v4164_v27 = vpop.f32.mrf.mxu0  ;;  %v4166_v40 = vpop.f32.mrf.mxu1 }
 0x545   : > { %2609 = vmatmul.msk.f32.gmra.mxu0 %vm448_vm1, %v1398_v22  ;;  %2641 = vmatmul.msk.f32.gmra.mxu1 %vm448_vm1, %v1398_v22 }
 0x54a   : > { %v4170_v20 = vpop.f32.mrf.mxu0  ;;  %v4172_v38 = vpop.f32.mrf.mxu1 }
 0x54b   : > { %4982 = vst [vmem:[#allocation42_spill] sm:$0xff] %v4170_v20  ;;  %v1753_v17 = vmax.f32 %v4170_v20, %v4172_v38 }
 0x54c   : > { %4983 = vst [vmem:[#allocation28_spill] sm:$0xff] %v4172_v38 }
 0x54d   : > { %2610 = vmatmul.msk.f32.gmra.mxu0 %vm448_vm1, %v1399_v29  ;;  %2642 = vmatmul.msk.f32.gmra.mxu1 %vm448_vm1, %v1399_v29 }
 0x54e   : > { %1754 = vmax.xlane.f32.xlu1 %v1753_v17 }
 0x552   : > { %v4178_v5 = vpop.f32.mrf.mxu0  ;;  %v4180_v37 = vpop.f32.mrf.mxu1 }
 0x553   : > { %v1756_v28 = vmax.f32 %v4178_v5, %v4180_v37 }
 0x555   : > { %2611 = vmatmul.msk.f32.gmra.mxu0 %vm448_vm1, %v1400_v55  ;;  %2643 = vmatmul.msk.f32.gmra.mxu1 %vm448_vm1, %v1400_v55 }
 0x55a   : > { %v4184_v19 = vpop.f32.mrf.mxu0  ;;  %v4186_v13 = vpop.f32.mrf.mxu1 }
 0x55b   : > { %v1759_v8 = vmax.f32 %v4184_v19, %v4186_v13 }
 0x55d   : > { %2612 = vmatmul.msk.f32.gmra.mxu0 %vm448_vm1, %v1401_v51  ;;  %2644 = vmatmul.msk.f32.gmra.mxu1 %vm448_vm1, %v1401_v51 }
 0x55e   : > { %1760 = vmax.xlane.f32.xlu0 %v1759_v8 }
 0x562   : > { %v4192_v11 = vpop.f32.mrf.mxu0  ;;  %v4194_v32 = vpop.f32.mrf.mxu1 }
 0x563   : > { %v1762_v53 = vmax.f32 %v4192_v11, %v4194_v32 }
 0x565   : > { %2613 = vmatmul.msk.f32.gmra.mxu0 %vm448_vm1, %v1402_v52  ;;  %2645 = vmatmul.msk.f32.gmra.mxu1 %vm448_vm1, %v1402_v52 }
 0x566   : > { %1763 = vmax.xlane.f32.xlu0 %v1762_v53 }
 0x56a   : > { %v4200_v35 = vpop.f32.mrf.mxu0  ;;  %v4202_v23 = vpop.f32.mrf.mxu1 }
 0x56b   : > { %v1765_v60 = vmax.f32 %v4200_v35, %v4202_v23 }
 0x56d   : > { %2614 = vmatmul.msk.f32.gmra.mxu0 %vm448_vm1, %v1403_v2  ;;  %2646 = vmatmul.msk.f32.gmra.mxu1 %vm448_vm1, %v1403_v2 }
 0x56e   : > { %1766 = vmax.xlane.f32.xlu0 %v1765_v60 }
 0x572   : > { %v4208_v36 = vpop.f32.mrf.mxu0  ;;  %v4210_v44 = vpop.f32.mrf.mxu1 }
 0x573   : > { %v1768_v4 = vmax.f32 %v4208_v36, %v4210_v44 }
 0x575   : > { %2615 = vmatmul.msk.f32.gmra.mxu0 %vm448_vm1, %v1404_v34  ;;  %2647 = vmatmul.msk.f32.gmra.mxu1 %vm448_vm1, %v1404_v34 }
 0x576   : > { %1769 = vmax.xlane.f32.xlu0 %v1768_v4 }
 0x57a   : > { %v4216_v33 = vpop.f32.mrf.mxu0  ;;  %v4218_v58 = vpop.f32.mrf.mxu1 }
 0x57b   : > { %v1771_v12 = vmax.f32 %v4216_v33, %v4218_v58 }
 0x57d   : > { %2616 = vmatmul.msk.f32.gmra.mxu0 %vm448_vm1, %v1405_v56  ;;  %2648 = vmatmul.msk.f32.gmra.mxu1 %vm448_vm1, %v1405_v56 }
 0x57e   : > { %1772 = vmax.xlane.f32.xlu0 %v1771_v12 }
 0x582   : > { %v4224_v59 = vpop.f32.mrf.mxu0  ;;  %v4226_v15 = vpop.f32.mrf.mxu1 }
 0x583   : > { %4984 = vst [vmem:[#allocation29_spill] sm:$0xff] %v4224_v59  ;;  %v1774_v18 = vmax.f32 %v4224_v59, %v4226_v15  ;;  %v1750_v59 = vmax.f32 %v4164_v27, %v4166_v40 }
 0x584   : > { %4985 = vst [vmem:[#allocation22_spill] sm:$0xff] %v4226_v15 }
 0x586   : > { %1775 = vmax.xlane.f32.xlu0 %v1774_v18 }
 0x58a   : > { %v4230_v0 = vpop.f32.mrf.mxu0  ;;  %v4232_v9 = vpop.f32.mrf.mxu1 }
 0x58b   : > { %4986 = vst [vmem:[#allocation23_spill] sm:$0xff] %v4230_v0 }
 0x58c   : > { %4987 = vst [vmem:[#allocation30_spill] sm:$0xff] %v4232_v9 }
 0x58e   : > { %1757 = vmax.xlane.f32.xlu0 %v1756_v28 }
 0x592   : > { %v4236_v14 = vpop.f32.mrf.mxu0  ;;  %v4238_v50 = vpop.f32.mrf.mxu1 }
 0x593   : > { %4988 = vst [vmem:[#allocation31_spill] sm:$0xff] %v4236_v14  ;;  %v1406_v14 = vpop.trf.xlu2 }
 0x594   : > { %4989 = vst [vmem:[#allocation34_spill] sm:$0xff] %v4238_v50  ;;  %2617 = vmatmul.msk.f32.gmra.mxu0 %vm448_vm1, %v1406_v14  ;;  %2649 = vmatmul.msk.f32.gmra.mxu1 %vm448_vm1, %v1406_v14  ;;  %v1741_v14 = vmax.f32 %v4146_v21, %v4148_v39 }
 0x59a   : > { %v4240_v48 = vpop.f32.mrf.mxu0  ;;  %v4242_v47 = vpop.f32.mrf.mxu1 }
 0x59b   : > { %4990 = vst [vmem:[#allocation35_spill] sm:$0xff] %v4240_v48 }
 0x59c   : > { %4991 = vst [vmem:[#allocation36_spill] sm:$0xff] %v4242_v47 }
 0x5a2   : > { %v4244_v25 = vpop.f32.mrf.mxu0  ;;  %v4246_v1 = vpop.f32.mrf.mxu1 }
 0x5aa   : > { %v4248_v22 = vpop.f32.mrf.mxu0  ;;  %v4250_v29 = vpop.f32.mrf.mxu1 }
 0x5b2   : > { %v4252_v55 = vpop.f32.mrf.mxu0  ;;  %v4254_v17 = vpop.f32.mrf.mxu1 }
 0x5ba   : > { %v4256_v51 = vpop.f32.mrf.mxu0  ;;  %v4258_v8 = vpop.f32.mrf.mxu1 }
 0x5c2   : > { %v4260_v52 = vpop.f32.mrf.mxu0  ;;  %v4262_v53 = vpop.f32.mrf.mxu1 }
 0x5ca   : > { %v4264_v2 = vpop.f32.mrf.mxu0  ;;  %v4266_v60 = vpop.f32.mrf.mxu1 }
 0x5d1   : > { %v1761_v34 = vpop.xlane.xlu0 %1760 }
 0x5d2   : > { %v1845_v4 = vsub.f32 %v4184_v19, %v1761_v34  ;;  %v1846_v56 = vsub.f32 %v4186_v13, %v1761_v34  ;;  %v4270_v12 = vpop.f32.mrf.mxu0  ;;  %v4272_v18 = vpop.f32.mrf.mxu1 }
 0x5d4   : > { %v1929_v28 = vmul.f32 1.442695, %v1845_v4  ;;  %v1931_v45 = vmul.f32 1.442695, %v1846_v56 }
 0x5d6   : > { %2924 = vpow2.f32 %v1929_v28 }
 0x5d7   : > { %2926 = vpow2.f32 %v1931_v45 }
 0x5d9   : > { %v4274_v30 = vpop.xlane.xlu0 %1763 }
 0x5da   : > { %v4276_v26 = vpop.f32.mrf.mxu0  ;;  %v4278_v16 = vpop.f32.mrf.mxu1 }
 0x5dc   : > { %v4280_v6 = vpop.eup %2924 }
 0x5dd   : > { %4992 = vst [vmem:[#allocation37_spill] sm:$0xff] %v4280_v6  ;;  %v4282_v63 = vpop.eup %2926 }
 0x5de   : > { %4993 = vst [vmem:[#allocation38_spill] sm:$0xff] %v4282_v63  ;;  %v2047_v19 = vadd.f32 %v4282_v63, %v4280_v6 }
 0x5e0   : > { %2048 = vadd.xlane.f32.xlu1 %v2047_v19 }
 0x5e1   : > { %v4286_v13 = vpop.xlane.xlu0 %1766 }
 0x5e2   : > { %v4288_v34 = vpop.f32.mrf.mxu0  ;;  %v4290_v4 = vpop.f32.mrf.mxu1 }
 0x5e9   : > { %v4292_v45 = vpop.xlane.xlu0 %1769 }
 0x5ea   : > { %v4294_v56 = vpop.f32.mrf.mxu0  ;;  %v4296_v28 = vpop.f32.mrf.mxu1 }
 0x5eb   : > { %v1813_v38 = vmax.f32 %v4294_v56, %v4296_v28 }
 0x5f1   : > { %v4298_v10 = vpop.xlane.xlu0 %1772 }
 0x5f2   : > { %v4300_v7 = vpop.f32.mrf.mxu0  ;;  %v4302_v0 = vpop.f32.mrf.mxu1 }
 0x5f3   : > { %v1816_v19 = vmax.f32 %v4300_v7, %v4302_v0 }
 0x5f5   : > { %1817 = vmax.xlane.f32.xlu0 %v1816_v19 }
 0x5f9   : > { %v4306_v63 = vpop.xlane.xlu0 %1775 }
 0x5fa   : > { %4994 = vst [vmem:[#allocation39_spill] sm:$0xff] %v4306_v63  ;;  %v4308_v6 = vpop.f32.mrf.mxu0  ;;  %v4310_v9 = vpop.f32.mrf.mxu1 }
 0x5fb   : > { %v1819_v20 = vmax.f32 %v4308_v6, %v4310_v9 }
 0x5fd   : > { %1814 = vmax.xlane.f32.xlu0 %v1813_v38  ;;  %1820 = vmax.xlane.f32.xlu2 %v1819_v20  ;;  %v1810_v20 = vmax.f32 %v4288_v34, %v4290_v4 }
 0x601   : > { %v1758_v19 = vpop.xlane.xlu0 %1757 }
 0x602   : > { %v1843_v50 = vsub.f32 %v4178_v5, %v1758_v19  ;;  %v1844_v15 = vsub.f32 %v4180_v37, %v1758_v19  ;;  %v1747_v37 = vmax.f32 %v4158_v43, %v4160_v42  ;;  %v1798_v19 = vmax.f32 %v4260_v52, %v4262_v53 }
 0x604   : > { %v1925_v63 = vmul.f32 1.442695, %v1843_v50  ;;  %v1927_v48 = vmul.f32 1.442695, %v1844_v15  ;;  %v1804_v15 = vmax.f32 %v4270_v12, %v4272_v18  ;;  %v1801_v50 = vmax.f32 %v4264_v2, %v4266_v60 }
 0x605   : > { %1751 = vmax.xlane.f32.xlu0 %v1750_v59  ;;  %v1744_v59 = vmax.f32 %v4152_v3, %v4154_v31 }
 0x606   : > { %2928 = vpow2.f32 %v1925_v63  ;;  %v1807_v63 = vmax.f32 %v4276_v26, %v4278_v16 }
 0x607   : > { %2930 = vpow2.f32 %v1927_v48  ;;  %v1738_v48 = vmax.f32 %v4140_v46, %v4142_v41 }
 0x60c   : > { %v4324_v38 = vpop.eup %2928 }
 0x60d   : > { %4995 = vst [vmem:[#allocation32_spill] sm:$0xff] %v4324_v38  ;;  %v4326_v47 = vpop.eup %2930  ;;  %1811 = vmax.xlane.f32.xlu0 %v1810_v20  ;;  %v1735_v20 = vmax.f32 %v4134_v54, %v4136_v24 }
 0x60e   : > { %4996 = vst [vmem:[#allocation33_spill] sm:$0xff] %v4326_v47  ;;  %v2044_v5 = vadd.f32 %v4326_v47, %v4324_v38 }
 0x610   : > { %2045 = vadd.xlane.f32.xlu1 %v2044_v5  ;;  %v1795_v5 = vmax.f32 %v4256_v51, %v4258_v8 }
 0x615   : > { %1748 = vmax.xlane.f32.xlu0 %v1747_v37  ;;  %v1732_v37 = vmax.f32 %v4128_v62, %v4130_v61 }
 0x61d   : > { %1808 = vmax.xlane.f32.xlu0 %v1807_v63 }
 0x625   : > { %1745 = vmax.xlane.f32.xlu0 %v1744_v59  ;;  %v1792_v59 = vmax.f32 %v4252_v55, %v4254_v17 }
 0x62d   : > { %1805 = vmax.xlane.f32.xlu0 %v1804_v15 }
 0x635   : > { %1742 = vmax.xlane.f32.xlu0 %v1741_v14  ;;  %v1851_v14 = vsub.f32 %v4208_v36, %v4292_v45 }
 0x637   : > { %v1941_v47 = vmul.f32 1.442695, %v1851_v14 }
 0x63d   : > { %1802 = vmax.xlane.f32.xlu0 %v1801_v50 }
 0x645   : > { %1739 = vmax.xlane.f32.xlu0 %v1738_v48 }
 0x64d   : > { %1799 = vmax.xlane.f32.xlu0 %v1798_v19  ;;  %v1852_v19 = vsub.f32 %v4210_v44, %v4292_v45  ;;  %v1789_v44 = vmax.f32 %v4248_v22, %v4250_v29 }
 0x655   : > { %1736 = vmax.xlane.f32.xlu0 %v1735_v20  ;;  %v1729_v20 = vmax.f32 %v4122_v57, %v4124_v49 }
 0x65d   : > { %1796 = vmax.xlane.f32.xlu0 %v1795_v5 }
 0x665   : > { %1733 = vmax.xlane.f32.xlu0 %v1732_v37 }
 0x668   : > { %v1818_v63 = vpop.xlane.xlu0 %1817 }
 0x669   : > { %v1883_v45 = vsub.f32 %v4300_v7, %v1818_v63 }
 0x66d   : > { %1793 = vmax.xlane.f32.xlu0 %v1792_v59  ;;  %v1943_v59 = vmul.f32 1.442695, %v1852_v19  ;;  %v2005_v19 = vmul.f32 1.442695, %v1883_v45 }
 0x670   : > { %v1815_v15 = vpop.xlane.xlu0 %1814 }
 0x671   : > { %v1881_v50 = vsub.f32 %v4294_v56, %v1815_v15  ;;  %v1882_v48 = vsub.f32 %v4296_v28, %v1815_v15 }
 0x673   : > { %v2001_v5 = vmul.f32 1.442695, %v1881_v50  ;;  %v2003_v37 = vmul.f32 1.442695, %v1882_v48  ;;  %v1884_v48 = vsub.f32 %v4302_v0, %v1818_v63 }
 0x675   : > { %2932 = vpow2.f32 %v2001_v5  ;;  %1730 = vmax.xlane.f32.xlu0 %v1729_v20  ;;  %v1850_v20 = vsub.f32 %v4202_v23, %v4286_v13  ;;  %v2007_v0 = vmul.f32 1.442695, %v1884_v48 }
 0x676   : > { %2934 = vpow2.f32 %v2003_v37 }
 0x677   : > { %2936 = vpow2.f32 %v1941_v47 }
 0x678   : > { %v1752_v38 = vpop.xlane.xlu0 %1751  ;;  %2938 = vpow2.f32 %v1943_v59 }
 0x679   : > { %v1839_v36 = vsub.f32 %v4164_v27, %v1752_v38  ;;  %v1840_v56 = vsub.f32 %v4166_v40, %v1752_v38  ;;  %v1821_v40 = vpop.xlane.xlu2 %1820  ;;  %v1849_v38 = vsub.f32 %v4200_v35, %v4286_v13 }
 0x67a   : > { %v1885_v5 = vsub.f32 %v4308_v6, %v1821_v40  ;;  %v1886_v37 = vsub.f32 %v4310_v9, %v1821_v40  ;;  %v1854_v40 = vsub.f32 %v4218_v58, %v4298_v10 }
 0x67b   : > { %v4364_v28 = vpop.eup %2932  ;;  %v1917_v15 = vmul.f32 1.442695, %v1839_v36  ;;  %v1919_v14 = vmul.f32 1.442695, %v1840_v56  ;;  %v1937_v36 = vmul.f32 1.442695, %v1849_v38  ;;  %v1786_v38 = vmax.f32 %v4244_v25, %v4246_v1 }
 0x67c   : > { %4997 = vst [vmem:[#allocation8_spill] sm:$0xff] %v4364_v28  ;;  %v4369_v50 = vpop.eup %2934  ;;  %v2009_v13 = vmul.f32 1.442695, %v1885_v5  ;;  %v2011_v45 = vmul.f32 1.442695, %v1886_v37 }
 0x67d   : > { %4998 = vst [vmem:[#allocation10_spill] sm:$0xff] %v4369_v50  ;;  %2940 = vpow2.f32 %v1917_v15  ;;  %1790 = vmax.xlane.f32.xlu0 %v1789_v44  ;;  %v2101_v27 = vadd.f32 %v4369_v50, %v4364_v28  ;;  %v4374_v47 = vpop.eup %2936  ;;  %v1939_v44 = vmul.f32 1.442695, %v1850_v20  ;;  %v1853_v15 = vsub.f32 %v4216_v33, %v4298_v10 }
 0x67e   : > { %2942 = vpow2.f32 %v1919_v14  ;;  %v4378_v7 = vpop.eup %2938  ;;  %v1947_v33 = vmul.f32 1.442695, %v1854_v40 }
 0x67f   : > { %2102 = vadd.xlane.f32.xlu1 %v2101_v27  ;;  %2944 = vpow2.f32 %v2005_v19  ;;  %v2056_v35 = vadd.f32 %v4378_v7, %v4374_v47  ;;  %v1945_v5 = vmul.f32 1.442695, %v1853_v15 }
 0x680   : > { %v4382_v63 = vpop.xlane.xlu0 %1811  ;;  %2946 = vpow2.f32 %v2007_v0 }
 0x681   : > { %2948 = vpow2.f32 %v1937_v36 }
 0x682   : > { %2950 = vpow2.f32 %v1939_v44 }
 0x683   : > { %v4386_v59 = vpop.eup %2940  ;;  %2952 = vpow2.f32 %v2009_v13 }
 0x684   : > { %v4390_v56 = vpop.eup %2942  ;;  %2954 = vpow2.f32 %v2011_v45 }
 0x685   : > { %2057 = vadd.xlane.f32.xlu0 %v2056_v35  ;;  %v2038_v23 = vadd.f32 %v4390_v56, %v4386_v59  ;;  %v4394_v9 = vpop.eup %2944 }
 0x686   : > { %4999 = vst [vmem:[#allocation9_spill] sm:$0xff] %v4394_v9  ;;  %v4400_v27 = vpop.eup %2946 }
 0x687   : > { %2039 = vadd.xlane.f32.xlu2 %v2038_v23  ;;  %5000 = vst [vmem:[#allocation11_spill] sm:$0xff] %v4400_v27  ;;  %v4406_v0 = vpop.eup %2948 }
 0x688   : > { %v1749_v6 = vpop.xlane.xlu0 %1748 }
 0x689   : > { %v1837_v14 = vsub.f32 %v4158_v43, %v1749_v6  ;;  %v1838_v48 = vsub.f32 %v4160_v42, %v1749_v6  ;;  %v2104_v43 = vadd.f32 %v4400_v27, %v4394_v9  ;;  %v4410_v42 = vpop.eup %2950 }
 0x68a   : > { %v4412_v37 = vpop.eup %2952  ;;  %v2053_v45 = vadd.f32 %v4410_v42, %v4406_v0 }
 0x68b   : > { %v1913_v19 = vmul.f32 1.442695, %v1837_v14  ;;  %v1915_v20 = vmul.f32 1.442695, %v1838_v48  ;;  %5001 = vst [vmem:[#allocation12_spill] sm:$0xff] %v4412_v37  ;;  %v4414_v10 = vpop.eup %2954 }
 0x68c   : > { %5002 = vst [vmem:[#allocation13_spill] sm:$0xff] %v4414_v10  ;;  %v2107_v6 = vadd.f32 %v4414_v10, %v4412_v37 }
 0x68d   : > { %2956 = vpow2.f32 %v1913_v19  ;;  %1787 = vmax.xlane.f32.xlu0 %v1786_v38 }
 0x68e   : > { %2958 = vpow2.f32 %v1915_v20 }
 0x68f   : > { %2105 = vadd.xlane.f32.xlu2 %v2104_v43  ;;  %2960 = vpow2.f32 %v1945_v5  ;;  %v4442_v5 = vpop.f32.mrf.mxu0  ;;  %v4444_v43 = vpop.f32.mrf.mxu1 }
 0x690   : > { %v1809_v58 = vpop.xlane.xlu0 %1808  ;;  %2962 = vpow2.f32 %v1947_v33 }
 0x691   : > { %v1877_v36 = vsub.f32 %v4276_v26, %v1809_v58  ;;  %v1878_v35 = vsub.f32 %v4278_v16, %v1809_v58  ;;  %v1847_v58 = vsub.f32 %v4192_v11, %v4274_v30 }
 0x693   : > { %v4418_v44 = vpop.eup %2956  ;;  %v1993_v23 = vmul.f32 1.442695, %v1877_v36  ;;  %v1995_v13 = vmul.f32 1.442695, %v1878_v35 }
 0x694   : > { %v4424_v15 = vpop.eup %2958 }
 0x695   : > { %2964 = vpow2.f32 %v1993_v23  ;;  %2054 = vadd.xlane.f32.xlu0 %v2053_v45  ;;  %v2035_v26 = vadd.f32 %v4424_v15, %v4418_v44  ;;  %v4428_v16 = vpop.eup %2960  ;;  %v1822_v23 = vmax.f32 %v4442_v5, %v4444_v43 }
 0x696   : > { %2966 = vpow2.f32 %v1995_v13  ;;  %v4430_v14 = vpop.eup %2962  ;;  %v1848_v13 = vsub.f32 %v4194_v32, %v4274_v30 }
 0x697   : > { %2036 = vadd.xlane.f32.xlu1 %v2035_v26  ;;  %2108 = vadd.xlane.f32.xlu2 %v2107_v6  ;;  %v2059_v38 = vadd.f32 %v4430_v14, %v4428_v16  ;;  %v1933_v26 = vmul.f32 1.442695, %v1847_v58 }
 0x698   : > { %v4432_v48 = vpop.xlane.xlu0 %1745 }
 0x69b   : > { %v4434_v40 = vpop.eup %2964 }
 0x69c   : > { %5003 = vst [vmem:[#allocation14_spill] sm:$0xff] %v4434_v40  ;;  %v4438_v19 = vpop.eup %2966 }
 0x69d   : > { %5004 = vst [vmem:[#allocation15_spill] sm:$0xff] %v4438_v19  ;;  %2060 = vadd.xlane.f32.xlu0 %v2059_v38  ;;  %v2095_v20 = vadd.f32 %v4438_v19, %v4434_v40  ;;  %v1935_v38 = vmul.f32 1.442695, %v1848_v13  ;;  %v5007_v19 = vld [vmem:[#allocation35_spill] sm:$0xff] }
 0x69f   : > { %2096 = vadd.xlane.f32.xlu2 %v2095_v20 }
 0x6a0   : > { %v1806_v33 = vpop.xlane.xlu0 %1805 }
 0x6a1   : > { %v1875_v36 = vsub.f32 %v4270_v12, %v1806_v33  ;;  %v1876_v35 = vsub.f32 %v4272_v18, %v1806_v33  ;;  %v5006_v33 = vld [vmem:[#allocation36_spill] sm:$0xff] }
 0x6a2   : > { %v1783_v40 = vmax.f32 %v5007_v19, %v5006_v33 }
 0x6a3   : > { %v1989_v45 = vmul.f32 1.442695, %v1875_v36  ;;  %v1991_v6 = vmul.f32 1.442695, %v1876_v35 }
 0x6a5   : > { %2968 = vpow2.f32 %v1989_v45  ;;  %1823 = vmax.xlane.f32.xlu0 %v1822_v23 }
 0x6a6   : > { %2970 = vpow2.f32 %v1991_v6 }
 0x6a7   : > { %2972 = vpow2.f32 %v1933_v26  ;;  %v5009_v26 = vld [vmem:[#allocation39_spill] sm:$0xff] }
 0x6a8   : > { %v1743_v20 = vpop.xlane.xlu0 %1742  ;;  %2974 = vpow2.f32 %v1935_v38  ;;  %v5010_v38 = vld [vmem:[#allocation29_spill] sm:$0xff] }
 0x6a9   : > { %v1833_v11 = vsub.f32 %v4146_v21, %v1743_v20  ;;  %v1834_v12 = vsub.f32 %v4148_v39, %v1743_v20  ;;  %v1855_v20 = vsub.f32 %v5010_v38, %v5009_v26  ;;  %v5014_v38 = vld [vmem:[#allocation42_spill] sm:$0xff] }
 0x6ab   : > { %v4456_v18 = vpop.eup %2968  ;;  %v1905_v30 = vmul.f32 1.442695, %v1833_v11  ;;  %v1907_v32 = vmul.f32 1.442695, %v1834_v12  ;;  %v1949_v28 = vmul.f32 1.442695, %v1855_v20 }
 0x6ac   : > { %5005 = vst [vmem:[#allocation26_spill] sm:$0xff] %v4456_v18  ;;  %v4460_v36 = vpop.eup %2970  ;;  %v5017_v20 = vld [vmem:[#allocation23_spill] sm:$0xff] }
 0x6ad   : > { %5008 = vst [vmem:[#allocation27_spill] sm:$0xff] %v4460_v36  ;;  %2976 = vpow2.f32 %v1905_v30  ;;  %1784 = vmax.xlane.f32.xlu0 %v1783_v40  ;;  %v2092_v58 = vadd.f32 %v4460_v36, %v4456_v18  ;;  %v4464_v35 = vpop.eup %2972  ;;  %v5011_v30 = vld [vmem:[#allocation22_spill] sm:$0xff]  ;;  %v5013_v36 = vld [vmem:[#allocation31_spill] sm:$0xff] }
 0x6ae   : > { %2978 = vpow2.f32 %v1907_v32  ;;  %v4466_v21 = vpop.eup %2974  ;;  %v1856_v32 = vsub.f32 %v5011_v30, %v5009_v26 }
 0x6af   : > { %2093 = vadd.xlane.f32.xlu1 %v2092_v58  ;;  %v2050_v13 = vadd.f32 %v4466_v21, %v4464_v35  ;;  %v5012_v58 = vld [vmem:[#allocation34_spill] sm:$0xff] }
 0x6b0   : > { %v4468_v39 = vpop.xlane.xlu0 %1802  ;;  %v1780_v18 = vmax.f32 %v5013_v36, %v5012_v58  ;;  %v1951_v27 = vmul.f32 1.442695, %v1856_v32 }
 0x6b3   : > { %v4470_v23 = vpop.eup %2976 }
 0x6b4   : > { %v4474_v45 = vpop.eup %2978 }
 0x6b5   : > { %2051 = vadd.xlane.f32.xlu0 %v2050_v13  ;;  %v2029_v40 = vadd.f32 %v4474_v45, %v4470_v23 }
 0x6b7   : > { %2030 = vadd.xlane.f32.xlu2 %v2029_v40  ;;  %v1755_v40 = vpop.xlane.xlu1 %1754 }
 0x6b8   : > { %v1740_v6 = vpop.xlane.xlu0 %1739  ;;  %v1841_v10 = vsub.f32 %v5014_v38, %v1755_v40 }
 0x6b9   : > { %v1831_v11 = vsub.f32 %v4140_v46, %v1740_v6  ;;  %v1832_v12 = vsub.f32 %v4142_v41, %v1740_v6  ;;  %v5015_v6 = vld [vmem:[#allocation28_spill] sm:$0xff] }
 0x6ba   : > { %v1842_v26 = vsub.f32 %v5015_v6, %v1755_v40 }
 0x6bb   : > { %v1901_v50 = vmul.f32 1.442695, %v1831_v11  ;;  %v1903_v13 = vmul.f32 1.442695, %v1832_v12  ;;  %v5016_v11 = vld [vmem:[#allocation30_spill] sm:$0xff] }
 0x6bd   : > { %2980 = vpow2.f32 %v1901_v50  ;;  %1781 = vmax.xlane.f32.xlu0 %v1780_v18  ;;  %v1777_v50 = vmax.f32 %v5017_v20, %v5016_v11 }
 0x6be   : > { %2982 = vpow2.f32 %v1903_v13  ;;  %v1921_v13 = vmul.f32 1.442695, %v1841_v10 }
 0x6bf   : > { %2984 = vpow2.f32 %v1949_v28  ;;  %v1923_v28 = vmul.f32 1.442695, %v1842_v26 }
 0x6c0   : > { %v1800_v9 = vpop.xlane.xlu0 %1799  ;;  %2986 = vpow2.f32 %v1951_v27 }
 0x6c1   : > { %v1871_v46 = vsub.f32 %v4260_v52, %v1800_v9  ;;  %v1872_v41 = vsub.f32 %v4262_v53, %v1800_v9 }
 0x6c3   : > { %v4490_v30 = vpop.eup %2980  ;;  %v1981_v18 = vmul.f32 1.442695, %v1871_v46  ;;  %v1983_v12 = vmul.f32 1.442695, %v1872_v41 }
 0x6c4   : > { %v4494_v32 = vpop.eup %2982 }
 0x6c5   : > { %2988 = vpow2.f32 %v1981_v18  ;;  %1778 = vmax.xlane.f32.xlu0 %v1777_v50  ;;  %v2026_v52 = vadd.f32 %v4494_v32, %v4490_v30  ;;  %v4498_v53 = vpop.eup %2984 }
 0x6c6   : > { %2990 = vpow2.f32 %v1983_v12  ;;  %v4500_v9 = vpop.eup %2986 }
 0x6c7   : > { %2027 = vadd.xlane.f32.xlu1 %v2026_v52  ;;  %2992 = vpow2.f32 %v1921_v13  ;;  %v2062_v10 = vadd.f32 %v4500_v9, %v4498_v53 }
 0x6c8   : > { %v4502_v27 = vpop.xlane.xlu0 %1736  ;;  %2994 = vpow2.f32 %v1923_v28 }
 0x6cb   : > { %v4504_v40 = vpop.eup %2988 }
 0x6cc   : > { %5018 = vst [vmem:[#allocation36_spill] sm:$0xff] %v4504_v40  ;;  %v4508_v38 = vpop.eup %2990 }
 0x6cd   : > { %5019 = vst [vmem:[#allocation35_spill] sm:$0xff] %v4508_v38  ;;  %2063 = vadd.xlane.f32.xlu0 %v2062_v10  ;;  %v2086_v46 = vadd.f32 %v4508_v38, %v4504_v40  ;;  %v4512_v41 = vpop.eup %2992 }
 0x6ce   : > { %v4514_v6 = vpop.eup %2994 }
 0x6cf   : > { %2087 = vadd.xlane.f32.xlu2 %v2086_v46  ;;  %v2041_v52 = vadd.f32 %v4514_v6, %v4512_v41 }
 0x6d0   : > { %v1797_v26 = vpop.xlane.xlu0 %1796 }
 0x6d1   : > { %v1869_v50 = vsub.f32 %v4256_v51, %v1797_v26  ;;  %v1870_v18 = vsub.f32 %v4258_v8, %v1797_v26 }
 0x6d3   : > { %v1977_v12 = vmul.f32 1.442695, %v1869_v50  ;;  %v1979_v13 = vmul.f32 1.442695, %v1870_v18 }
 0x6d5   : > { %2996 = vpow2.f32 %v1977_v12  ;;  %2042 = vadd.xlane.f32.xlu0 %v2041_v52 }
 0x6d6   : > { %2998 = vpow2.f32 %v1979_v13 }
 0x6d8   : > { %v1734_v28 = vpop.xlane.xlu0 %1733 }
 0x6d9   : > { %v1827_v10 = vsub.f32 %v4128_v62, %v1734_v28  ;;  %v1828_v46 = vsub.f32 %v4130_v61, %v1734_v28 }
 0x6db   : > { %v4522_v38 = vpop.eup %2996  ;;  %v1893_v40 = vmul.f32 1.442695, %v1827_v10  ;;  %v1895_v37 = vmul.f32 1.442695, %v1828_v46 }
 0x6dc   : > { %5020 = vst [vmem:[#allocation39_spill] sm:$0xff] %v4522_v38  ;;  %v4524_v51 = vpop.eup %2998 }
 0x6dd   : > { %5021 = vst [vmem:[#allocation29_spill] sm:$0xff] %v4524_v51  ;;  %3000 = vpow2.f32 %v1893_v40  ;;  %v2083_v8 = vadd.f32 %v4524_v51, %v4522_v38 }
 0x6de   : > { %3002 = vpow2.f32 %v1895_v37 }
 0x6df   : > { %2084 = vadd.xlane.f32.xlu1 %v2083_v8 }
 0x6e0   : > { %v4528_v26 = vpop.xlane.xlu0 %1793 }
 0x6e3   : > { %v4530_v50 = vpop.eup %3000 }
 0x6e4   : > { %v4532_v18 = vpop.eup %3002 }
 0x6e5   : > { %v2020_v62 = vadd.f32 %v4532_v18, %v4530_v50 }
 0x6e7   : > { %2021 = vadd.xlane.f32.xlu2 %v2020_v62 }
 0x6e8   : > { %v1731_v61 = vpop.xlane.xlu0 %1730 }
 0x6e9   : > { %v1825_v12 = vsub.f32 %v4122_v57, %v1731_v61  ;;  %v1826_v40 = vsub.f32 %v4124_v49, %v1731_v61 }
 0x6eb   : > { %v1889_v13 = vmul.f32 1.442695, %v1825_v12  ;;  %v1891_v52 = vmul.f32 1.442695, %v1826_v40 }
 0x6ed   : > { %3004 = vpow2.f32 %v1889_v13 }
 0x6ee   : > { %3006 = vpow2.f32 %v1891_v52 }
 0x6f0   : > { %v1791_v37 = vpop.xlane.xlu0 %1790 }
 0x6f1   : > { %v1865_v28 = vsub.f32 %v4248_v22, %v1791_v37  ;;  %v1866_v10 = vsub.f32 %v4250_v29, %v1791_v37  ;;  %v1879_v37 = vsub.f32 %v4288_v34, %v4382_v63  ;;  %v1835_v34 = vsub.f32 %v4152_v3, %v4432_v48 }
 0x6f3   : > { %v4540_v46 = vpop.eup %3004  ;;  %v1969_v8 = vmul.f32 1.442695, %v1865_v28  ;;  %v1971_v51 = vmul.f32 1.442695, %v1866_v10 }
 0x6f4   : > { %v4542_v38 = vpop.eup %3006 }
 0x6f5   : > { %5022 = vst [vmem:[#allocation22_spill] sm:$0xff] %v4542_v38  ;;  %3008 = vpow2.f32 %v1969_v8  ;;  %v2017_v57 = vadd.f32 %v4542_v38, %v4540_v46  ;;  %v1880_v8 = vsub.f32 %v4290_v4, %v4382_v63  ;;  %v1836_v4 = vsub.f32 %v4154_v31, %v4432_v48 }
 0x6f6   : > { %3010 = vpow2.f32 %v1971_v51  ;;  %v1873_v31 = vsub.f32 %v4264_v2, %v4468_v39 }
 0x6f7   : > { %2018 = vadd.xlane.f32.xlu1 %v2017_v57  ;;  %v1997_v57 = vmul.f32 1.442695, %v1879_v37 }
 0x6f8   : > { %v4546_v49 = vpop.xlane.xlu0 %2057 }
 0x6fb   : > { %v4548_v62 = vpop.eup %3008 }
 0x6fc   : > { %5023 = vst [vmem:[#allocation34_spill] sm:$0xff] %v4548_v62  ;;  %v4550_v61 = vpop.eup %3010 }
 0x6fd   : > { %5024 = vst [vmem:[#allocation31_spill] sm:$0xff] %v4550_v61  ;;  %v2077_v22 = vadd.f32 %v4550_v61, %v4548_v62 }
 0x6ff   : > { %2078 = vadd.xlane.f32.xlu2 %v2077_v22  ;;  %v1999_v22 = vmul.f32 1.442695, %v1880_v8 }
 0x700   : > { %v4554_v29 = vpop.xlane.xlu0 %1787 }
 0x708   : > { %v4556_v12 = vpop.xlane.xlu0 %2054 }
 0x710   : > { %v4558_v40 = vpop.xlane.xlu0 %2060 }
 0x718   : > { %v1824_v13 = vpop.xlane.xlu0 %1823 }
 0x719   : > { %v1887_v51 = vsub.f32 %v4442_v5, %v1824_v13  ;;  %v1888_v52 = vsub.f32 %v4444_v43, %v1824_v13 }
 0x71b   : > { %v2013_v28 = vmul.f32 1.442695, %v1887_v51  ;;  %v2015_v10 = vmul.f32 1.442695, %v1888_v52 }
 0x71d   : > { %3012 = vpow2.f32 %v2013_v28 }
 0x71e   : > { %3014 = vpow2.f32 %v2015_v10  ;;  %v1985_v10 = vmul.f32 1.442695, %v1873_v31 }
 0x71f   : > { %3016 = vpow2.f32 %v1997_v57 }
 0x720   : > { %v1785_v61 = vpop.xlane.xlu0 %1784  ;;  %3018 = vpow2.f32 %v1999_v22 }
 0x721   : > { %v1861_v62 = vsub.f32 %v5007_v19, %v1785_v61  ;;  %v1862_v38 = vsub.f32 %v5006_v33, %v1785_v61  ;;  %v1909_v19 = vmul.f32 1.442695, %v1835_v34  ;;  %v1911_v33 = vmul.f32 1.442695, %v1836_v4 }
 0x722   : > { %v1830_v4 = vsub.f32 %v4136_v24, %v4502_v27 }
 0x723   : > { %v4568_v5 = vpop.eup %3012  ;;  %v1961_v43 = vmul.f32 1.442695, %v1861_v62  ;;  %v1963_v13 = vmul.f32 1.442695, %v1862_v38  ;;  %v1874_v62 = vsub.f32 %v4266_v60, %v4468_v39  ;;  %v1829_v60 = vsub.f32 %v4134_v54, %v4502_v27 }
 0x724   : > { %v4572_v51 = vpop.eup %3014  ;;  %v1867_v54 = vsub.f32 %v4252_v55, %v4528_v26  ;;  %v1868_v27 = vsub.f32 %v4254_v17, %v4528_v26  ;;  %v1863_v17 = vsub.f32 %v4244_v25, %v4554_v29  ;;  %v1864_v26 = vsub.f32 %v4246_v1, %v4554_v29 }
 0x725   : > { %3020 = vpow2.f32 %v1961_v43  ;;  %v2110_v63 = vadd.f32 %v4572_v51, %v4568_v5  ;;  %v4580_v52 = vpop.eup %3016  ;;  %v1987_v8 = vmul.f32 1.442695, %v1874_v62 }
 0x726   : > { %3022 = vpow2.f32 %v1963_v13  ;;  %v4582_v3 = vpop.eup %3018 }
 0x727   : > { %2111 = vadd.xlane.f32.xlu0 %v2110_v63  ;;  %3024 = vpow2.f32 %v1909_v19  ;;  %v2098_v37 = vadd.f32 %v4582_v3, %v4580_v52 }
 0x728   : > { %v4578_v61 = vpop.xlane.xlu0 %2051  ;;  %3026 = vpow2.f32 %v1911_v33 }
 0x729   : > { %3028 = vpow2.f32 %v1985_v10  ;;  %v1973_v10 = vmul.f32 1.442695, %v1867_v54 }
 0x72a   : > { %3030 = vpow2.f32 %v1987_v8  ;;  %v1975_v8 = vmul.f32 1.442695, %v1868_v27 }
 0x72b   : > { %v4584_v38 = vpop.eup %3020 }
 0x72c   : > { %v4588_v48 = vpop.eup %3022 }
 0x72d   : > { %v2071_v28 = vadd.f32 %v4588_v48, %v4584_v38  ;;  %v4596_v22 = vpop.eup %3024 }
 0x72e   : > { %v4600_v43 = vpop.eup %3026 }
 0x72f   : > { %2099 = vadd.xlane.f32.xlu0 %v2098_v37  ;;  %2072 = vadd.xlane.f32.xlu1 %v2071_v28  ;;  %v2032_v63 = vadd.f32 %v4600_v43, %v4596_v22  ;;  %v4608_v33 = vpop.eup %3028 }
 0x730   : > { %v1782_v57 = vpop.xlane.xlu0 %1781  ;;  %v4610_v31 = vpop.eup %3030 }
 0x731   : > { %v1859_v2 = vsub.f32 %v5013_v36, %v1782_v57  ;;  %v1860_v34 = vsub.f32 %v5012_v58, %v1782_v57  ;;  %v1897_v36 = vmul.f32 1.442695, %v1829_v60  ;;  %v1899_v58 = vmul.f32 1.442695, %v1830_v4  ;;  %v2049_v4 = vpop.xlane.xlu1 %2048 }
 0x732   : > { %v2089_v37 = vadd.f32 %v4610_v31, %v4608_v33  ;;  %v1965_v60 = vmul.f32 1.442695, %v1863_v17 }
 0x733   : > { %v1957_v39 = vmul.f32 1.442695, %v1859_v2  ;;  %v1959_v13 = vmul.f32 1.442695, %v1860_v34 }
 0x735   : > { %3032 = vpow2.f32 %v1957_v39 }
 0x736   : > { %3034 = vpow2.f32 %v1959_v13 }
 0x737   : > { %2033 = vadd.xlane.f32.xlu0 %v2032_v63  ;;  %3036 = vpow2.f32 %v1897_v36  ;;  %v1967_v63 = vmul.f32 1.442695, %v1864_v26 }
 0x738   : > { %v1779_v19 = vpop.xlane.xlu0 %1778  ;;  %3038 = vpow2.f32 %v1899_v58 }
 0x739   : > { %v1857_v1 = vsub.f32 %v5017_v20, %v1779_v19  ;;  %v2046_v20 = vpop.xlane.xlu1 %2045 }
 0x73b   : > { %v4614_v62 = vpop.eup %3032  ;;  %v1953_v27 = vmul.f32 1.442695, %v1857_v1  ;;  %v5028_v1 = vld [vmem:[#allocation33_spill] sm:$0xff] }
 0x73c   : > { %v4616_v24 = vpop.eup %3034 }
 0x73d   : > { %v2068_v28 = vadd.f32 %v4616_v24, %v4614_v62  ;;  %v4624_v57 = vpop.eup %3036 }
 0x73e   : > { %v4626_v2 = vpop.eup %3038 }
 0x73f   : > { %2090 = vadd.xlane.f32.xlu0 %v2089_v37  ;;  %2069 = vadd.xlane.f32.xlu2 %v2068_v28  ;;  %v2023_v34 = vadd.f32 %v4626_v2, %v4624_v57 }
 0x740   : > { %v2064_v55 = vpop.xlane.xlu0 %2063 }
 0x741   : > { %3040 = vrcp.f32 %v2064_v55 }
 0x742   : > { %3042 = vpow2.f32 %v1973_v10 }
 0x743   : > { %3044 = vrcp.f32 %v4558_v40 }
 0x744   : > { %3046 = vpow2.f32 %v1975_v8 }
 0x745   : > { %3048 = vrcp.f32 %v4546_v49  ;;  %v1858_v49 = vsub.f32 %v5016_v11, %v1779_v19 }
 0x746   : > { %3050 = vpow2.f32 %v1965_v60  ;;  %v5025_v60 = vld [vmem:[#allocation37_spill] sm:$0xff] }
 0x747   : > { %v3041_v39 = vpop.eup %3040  ;;  %2024 = vadd.xlane.f32.xlu0 %v2023_v34  ;;  %3052 = vrcp.f32 %v4556_v12  ;;  %v1955_v37 = vmul.f32 1.442695, %v1858_v49 }
 0x748   : > { %v4636_v13 = vpop.eup %3042  ;;  %v2175_v25 = vmul.f32 %v3041_v39, %v4498_v53  ;;  %v2176_v40 = vmul.f32 %v3041_v39, %v4500_v9  ;;  %3054 = vpow2.f32 %v1967_v63  ;;  %v2043_v55 = vpop.xlane.xlu0 %2042 }
 0x749   : > { %v3045_v36 = vpop.eup %3044  ;;  %3056 = vrcp.f32 %v4578_v61 }
 0x74a   : > { %v4640_v58 = vpop.eup %3046  ;;  %2209 = vmatpush.xpose.msra.mxu2 %v2175_v25  ;;  %2232 = vmatpush.xpose.msra.mxu3 %v2176_v40  ;;  %v2173_v29 = vmul.f32 %v3045_v36, %v4428_v16  ;;  %v2174_v54 = vmul.f32 %v3045_v36, %v4430_v14  ;;  %3058 = vrcp.f32 %v2049_v4  ;;  %v5026_v4 = vld [vmem:[#allocation38_spill] sm:$0xff] }
 0x74b   : > { %v3049_v53 = vpop.eup %3048  ;;  %v2080_v9 = vadd.f32 %v4640_v58, %v4636_v13  ;;  %3060 = vpow2.f32 %v1953_v27 }
 0x74c   : > { %v4650_v12 = vpop.eup %3050  ;;  %v2171_v11 = vmul.f32 %v3049_v53, %v4374_v47  ;;  %v2172_v16 = vmul.f32 %v3049_v53, %v4378_v7  ;;  %3062 = vpow2.f32 %v1955_v37  ;;  %v4660_v7 = vpop.xlane.xlu1 %2102 }
 0x74d   : > { %v3053_v19 = vpop.eup %3052  ;;  %3064 = vrcp.f32 %v2046_v20 }
 0x74e   : > { %2210 = vmatpush.xpose.msra.mxu2 %v2173_v29  ;;  %2233 = vmatpush.xpose.msra.mxu3 %v2174_v54  ;;  %v4654_v14 = vpop.eup %3054  ;;  %v2169_v61 = vmul.f32 %v3053_v19, %v4406_v0  ;;  %v2170_v28 = vmul.f32 %v3053_v19, %v4410_v42  ;;  %3066 = vrcp.f32 %v2043_v55  ;;  %v2040_v42 = vpop.xlane.xlu2 %2039 }
 0x74f   : > { %2081 = vadd.xlane.f32.xlu0 %v2080_v9  ;;  %v3057_v10 = vpop.eup %3056  ;;  %v2074_v8 = vadd.f32 %v4654_v14, %v4650_v12  ;;  %3068 = vrcp.f32 %v2040_v42 }
 0x750   : > { %v3059_v47 = vpop.eup %3058  ;;  %v2167_v17 = vmul.f32 %v3057_v10, %v4464_v35  ;;  %v2168_v26 = vmul.f32 %v3057_v10, %v4466_v21  ;;  %v5027_v21 = vld [vmem:[#allocation32_spill] sm:$0xff] }
 0x751   : > { %v4664_v34 = vpop.eup %3060  ;;  %v2165_v39 = vmul.f32 %v3059_v47, %v5025_v60  ;;  %v2166_v63 = vmul.f32 %v3059_v47, %v5026_v4 }
 0x752   : > { %2211 = vmatpush.xpose.msra.mxu2 %v2171_v11  ;;  %2234 = vmatpush.xpose.msra.mxu3 %v2172_v16  ;;  %v4666_v0 = vpop.eup %3062 }
 0x753   : > { %v3065_v25 = vpop.eup %3064  ;;  %v2065_v40 = vadd.f32 %v4666_v0, %v4664_v34 }
 0x754   : > { %v2037_v35 = vpop.xlane.xlu1 %2036  ;;  %v2163_v36 = vmul.f32 %v3065_v25, %v5027_v21  ;;  %v2164_v49 = vmul.f32 %v3065_v25, %v5028_v1  ;;  %v3067_v29 = vpop.eup %3066 }
 0x755   : > { %3070 = vrcp.f32 %v2037_v35  ;;  %v2161_v54 = vmul.f32 %v3067_v29, %v4512_v41  ;;  %v2162_v53 = vmul.f32 %v3067_v29, %v4514_v6  ;;  %v3069_v9 = vpop.eup %3068  ;;  %v5029_v29 = vld [vmem:[#allocation22_spill] sm:$0xff] }
 0x756   : > { %2212 = vmatpush.xpose.msra.mxu2 %v2169_v61  ;;  %2235 = vmatpush.xpose.msra.mxu3 %v2170_v28  ;;  %v2159_v27 = vmul.f32 %v3069_v9, %v4386_v59  ;;  %v2160_v20 = vmul.f32 %v3069_v9, %v4390_v56  ;;  %v2106_v19 = vpop.xlane.xlu2 %2105  ;;  %v5032_v9 = vld [vmem:[#allocation12_spill] sm:$0xff] }
 0x757   : > { %2075 = vadd.xlane.f32.xlu0 %v2074_v8 }
 0x75a   : > { %2213 = vmatpush.xpose.msra.mxu2 %v2167_v17  ;;  %2236 = vmatpush.xpose.msra.mxu3 %v2168_v26 }
 0x75b   : > { %v3071_v37 = vpop.eup %3070 }
 0x75c   : > { %v2157_v11 = vmul.f32 %v3071_v37, %v4418_v44  ;;  %v2158_v16 = vmul.f32 %v3071_v37, %v4424_v15  ;;  %v4684_v10 = vpop.xlane.xlu1 %2093 }
 0x75e   : > { %2214 = vmatpush.xpose.msra.mxu2 %v2165_v39  ;;  %2237 = vmatpush.xpose.msra.mxu3 %v2166_v63  ;;  %v2109_v41 = vpop.xlane.xlu2 %2108 }
 0x75f   : > { %2066 = vadd.xlane.f32.xlu0 %v2065_v40 }
 0x762   : > { %2215 = vmatpush.xpose.msra.mxu2 %v2163_v36  ;;  %2238 = vmatpush.xpose.msra.mxu3 %v2164_v49 }
 0x764   : > { %v2028_v8 = vpop.xlane.xlu1 %2027 }
 0x766   : > { %2216 = vmatpush.xpose.msra.mxu2 %v2161_v54  ;;  %2239 = vmatpush.xpose.msra.mxu3 %v2162_v53  ;;  %v4680_v6 = vpop.xlane.xlu2 %2096 }
 0x76a   : > { %2217 = vmatpush.xpose.msra.mxu2 %v2159_v27  ;;  %2240 = vmatpush.xpose.msra.mxu3 %v2160_v20 }
 0x76c   : > { %v4692_v42 = vpop.xlane.xlu1 %2084 }
 0x76e   : > { %2218 = vmatpush.xpose.msra.mxu2 %v2157_v11  ;;  %2241 = vmatpush.xpose.msra.mxu3 %v2158_v16  ;;  %v2031_v59 = vpop.xlane.xlu2 %2030  ;;  %v5035_v11 = vld [vmem:[#allocation11_spill] sm:$0xff] }
 0x776   : > { %v4686_v44 = vpop.xlane.xlu2 %2087 }
 0x77e   : > { %v2022_v63 = vpop.xlane.xlu2 %2021 }
 0x79a   : > { %v2112_v61 = vpop.xlane.xlu0 %2111 }
 0x7a2   : > { %v4682_v28 = vpop.xlane.xlu0 %2099 }
 0x7aa   : > { %v2034_v56 = vpop.xlane.xlu0 %2033 }
 0x7ab   : > { %3072 = vrcp.f32 %v2034_v56  ;;  %v5039_v56 = vld [vmem:[#allocation10_spill] sm:$0xff] }
 0x7ac   : > { %3074 = vrcp.f32 %v2031_v59 }
 0x7ad   : > { %3076 = vrcp.f32 %v2028_v8 }
 0x7b1   : > { %v3073_v47 = vpop.eup %3072 }
 0x7b2   : > { %v4688_v15 = vpop.xlane.xlu0 %2090  ;;  %v2155_v55 = vmul.f32 %v3073_v47, %v4596_v22  ;;  %v2156_v17 = vmul.f32 %v3073_v47, %v4600_v43  ;;  %v3075_v26 = vpop.eup %3074 }
 0x7b3   : > { %v2153_v60 = vmul.f32 %v3075_v26, %v4470_v23  ;;  %v2154_v39 = vmul.f32 %v3075_v26, %v4474_v45  ;;  %v3077_v4 = vpop.eup %3076  ;;  %v2019_v43 = vpop.xlane.xlu1 %2018 }
 0x7b4   : > { %2219 = vmatpush.xpose.msra.mxu2 %v2155_v55  ;;  %2242 = vmatpush.xpose.msra.mxu3 %v2156_v17  ;;  %v2151_v40 = vmul.f32 %v3077_v4, %v4490_v30  ;;  %v2152_v22 = vmul.f32 %v3077_v4, %v4494_v32 }
 0x7b8   : > { %2220 = vmatpush.xpose.msra.mxu2 %v2153_v60  ;;  %2243 = vmatpush.xpose.msra.mxu3 %v2154_v39  ;;  %v5041_v60 = vld [vmem:[#allocation15_spill] sm:$0xff] }
 0x7ba   : > { %v2025_v25 = vpop.xlane.xlu0 %2024 }
 0x7bb   : > { %3078 = vrcp.f32 %v2025_v25  ;;  %v5043_v25 = vld [vmem:[#allocation27_spill] sm:$0xff] }
 0x7bc   : > { %2221 = vmatpush.xpose.msra.mxu2 %v2151_v40  ;;  %2244 = vmatpush.xpose.msra.mxu3 %v2152_v22  ;;  %3080 = vrcp.f32 %v2022_v63  ;;  %v5042_v63 = vld [vmem:[#allocation26_spill] sm:$0xff] }
 0x7bd   : > { %3082 = vrcp.f32 %v2019_v43 }
 0x7be   : > { %3084 = vrcp.f32 %v2112_v61  ;;  %v5038_v61 = vld [vmem:[#allocation8_spill] sm:$0xff] }
 0x7bf   : > { %3086 = vrcp.f32 %v2109_v41  ;;  %v5037_v41 = vld [vmem:[#allocation19_spill] sm:$0xff] }
 0x7c0   : > { %3088 = vrcp.f32 %v2106_v19 }
 0x7c1   : > { %v3079_v35 = vpop.eup %3078  ;;  %3090 = vrcp.f32 %v4660_v7  ;;  %v5036_v7 = vld [vmem:[#allocation18_spill] sm:$0xff] }
 0x7c2   : > { %v2149_v23 = vmul.f32 %v3079_v35, %v4624_v57  ;;  %v2150_v45 = vmul.f32 %v3079_v35, %v4626_v2  ;;  %v3081_v21 = vpop.eup %3080  ;;  %3092 = vrcp.f32 %v4682_v28  ;;  %v2079_v35 = vpop.xlane.xlu2 %2078 }
 0x7c3   : > { %v2147_v30 = vmul.f32 %v3081_v21, %v4530_v50  ;;  %v2148_v32 = vmul.f32 %v3081_v21, %v4532_v18  ;;  %v3083_v36 = vpop.eup %3082  ;;  %v5030_v50 = vld [vmem:[#allocation16_spill] sm:$0xff]  ;;  %v5031_v18 = vld [vmem:[#allocation17_spill] sm:$0xff]  ;;  %3094 = vrcp.f32 %v4680_v6  ;;  %v5040_v6 = vld [vmem:[#allocation14_spill] sm:$0xff] }
 0x7c4   : > { %2222 = vmatpush.xpose.msra.mxu2 %v2149_v23  ;;  %2245 = vmatpush.xpose.msra.mxu3 %v2150_v45  ;;  %v3085_v1 = vpop.eup %3084  ;;  %v2145_v49 = vmul.f32 %v3083_v36, %v4540_v46  ;;  %v2146_v54 = vmul.f32 %v3083_v36, %v5029_v29  ;;  %v5033_v46 = vld [vmem:[#allocation13_spill] sm:$0xff]  ;;  %3096 = vrcp.f32 %v4684_v10  ;;  %v5045_v45 = vld [vmem:[#allocation35_spill] sm:$0xff] }
 0x7c5   : > { %v2207_v57 = vmul.f32 %v3085_v1, %v4568_v5  ;;  %v2208_v2 = vmul.f32 %v3085_v1, %v4572_v51  ;;  %v3087_v53 = vpop.eup %3086  ;;  %v5034_v5 = vld [vmem:[#allocation9_spill] sm:$0xff]  ;;  %3098 = vrcp.f32 %v4688_v15  ;;  %v5046_v36 = vld [vmem:[#allocation39_spill] sm:$0xff] }
 0x7c6   : > { %v2205_v27 = vmul.f32 %v3087_v53, %v5032_v9  ;;  %v2206_v20 = vmul.f32 %v3087_v53, %v5033_v46  ;;  %v3089_v37 = vpop.eup %3088  ;;  %3100 = vrcp.f32 %v4686_v44  ;;  %v5044_v44 = vld [vmem:[#allocation36_spill] sm:$0xff]  ;;  %v5047_v1 = vld [vmem:[#allocation29_spill] sm:$0xff]  ;;  %v5048_v53 = vld [vmem:[#allocation34_spill] sm:$0xff] }
 0x7c7   : > { %v2203_v51 = vmul.f32 %v3089_v37, %v5034_v5  ;;  %v2204_v16 = vmul.f32 %v3089_v37, %v5035_v11  ;;  %v3091_v19 = vpop.eup %3090  ;;  %3102 = vrcp.f32 %v4692_v42 }
 0x7c8   : > { %2223 = vmatpush.xpose.msra.mxu2 %v2147_v30  ;;  %2246 = vmatpush.xpose.msra.mxu3 %v2148_v32  ;;  %v2201_v59 = vmul.f32 %v3091_v19, %v5038_v61  ;;  %v2202_v8 = vmul.f32 %v3091_v19, %v5039_v56  ;;  %v3093_v47 = vpop.eup %3092 }
 0x7c9   : > { %v2199_v28 = vmul.f32 %v3093_v47, %v4580_v52  ;;  %v2200_v55 = vmul.f32 %v3093_v47, %v4582_v3  ;;  %v3095_v17 = vpop.eup %3094  ;;  %v2082_v3 = vpop.xlane.xlu0 %2081  ;;  %v5051_v47 = vld [vmem:[#allocation43_spill] sm:$0xff] }
 0x7ca   : > { %v2197_v26 = vmul.f32 %v3095_v17, %v5040_v6  ;;  %v2198_v39 = vmul.f32 %v3095_v17, %v5041_v60  ;;  %v3097_v4 = vpop.eup %3096  ;;  %3104 = vrcp.f32 %v2082_v3  ;;  %v3217_v60 = vmov 0   ;;  %v5054_v3 = vld [vmem:[#allocation25_spill] sm:$0xff] }
 0x7cb   : > { %v2195_v10 = vmul.f32 %v3097_v4, %v5042_v63  ;;  %v2196_v52 = vmul.f32 %v3097_v4, %v5043_v25  ;;  %v3099_v40 = vpop.eup %3098  ;;  %3106 = vrcp.f32 %v2079_v35  ;;  %2729 = vset.pattern.permute.xlu1 %v3217_v60  ;;  %2731 = vset.pattern.permute.xlu0 %v3217_v60  ;;  %v239_v25 = vld [vmem:[%s4829_s3 + $0x10] sm:$0xff]  ;;  %v5057_v35 = vld [vmem:[#allocation24_spill] sm:$0xff] }
 0x7cc   : > { %2224 = vmatpush.xpose.msra.mxu2 %v2145_v49  ;;  %2247 = vmatpush.xpose.msra.mxu3 %v2146_v54  ;;  %v2193_v15 = vmul.f32 %v3099_v40, %v4608_v33  ;;  %v2194_v22 = vmul.f32 %v3099_v40, %v4610_v31  ;;  %v3101_v43 = vpop.eup %3100  ;;  %v2073_v31 = vpop.xlane.xlu1 %2072 }
 0x7cd   : > { %v2191_v23 = vmul.f32 %v3101_v43, %v5044_v44  ;;  %v2192_v21 = vmul.f32 %v3101_v43, %v5045_v45  ;;  %v3103_v30 = vpop.eup %3102  ;;  %2730 = vset.pattern.permute.xlu2 %v3217_v60  ;;  %2313 = vperm.xlu0 %2731, %v239_v25   ;;  %v5056_v43 = vld [vmem:[#allocation44_spill] sm:$0xff] }
 0x7ce   : > { %v2189_v42 = vmul.f32 %v3103_v30, %v5046_v36  ;;  %v2190_v33 = vmul.f32 %v3103_v30, %v5047_v1  ;;  %v1338_v44 = vadd.f32 %v5057_v35, %v5056_v43 }
 0x7cf   : > { %2225 = vmatmul.f32.vlgmr.msra.gmra.mxu2 %v5030_v50  ;;  %2248 = vmatmul.f32.vlgmr.msra.gmra.mxu3 %v5031_v18 }
 0x7d0   : > { %2255 = vmatpush.xpose.msrb.mxu2 %v2207_v57  ;;  %2278 = vmatpush.xpose.msrb.mxu3 %v2208_v2  ;;  %v3105_v49 = vpop.eup %3104  ;;  %v2070_v2 = vpop.xlane.xlu2 %2069 }
 0x7d1   : > { %v2076_v32 = vpop.xlane.xlu0 %2075  ;;  %v2187_v29 = vmul.f32 %v3105_v49, %v4636_v13  ;;  %v2188_v54 = vmul.f32 %v3105_v49, %v4640_v58  ;;  %v3107_v57 = vpop.eup %3106 }
 0x7d2   : > { %3108 = vrcp.f32 %v2076_v32  ;;  %v2185_v9 = vmul.f32 %v3107_v57, %v5048_v53 }
 0x7d3   : > { %3110 = vrcp.f32 %v2073_v31 }
 0x7d4   : > { %2256 = vmatpush.xpose.msrb.mxu2 %v2205_v27  ;;  %2279 = vmatpush.xpose.msrb.mxu3 %v2206_v20  ;;  %v5049_v27 = vld [vmem:[#allocation31_spill] sm:$0xff]  ;;  %3112 = vrcp.f32 %v2070_v2 }
 0x7d5   : > { %v2186_v46 = vmul.f32 %v3107_v57, %v5049_v27 }
 0x7d7   : > { %2228 = vmatmul.f32.gmra.mxu2 %v5036_v7  ;;  %2251 = vmatmul.f32.gmra.mxu3 %v5037_v41 }
 0x7d8   : > { %2257 = vmatpush.xpose.msrb.mxu2 %v2203_v51  ;;  %2280 = vmatpush.xpose.msrb.mxu3 %v2204_v16  ;;  %v3109_v20 = vpop.eup %3108 }
 0x7d9   : > { %v2067_v37 = vpop.xlane.xlu0 %2066  ;;  %v2183_v5 = vmul.f32 %v3109_v20, %v4650_v12  ;;  %v2184_v13 = vmul.f32 %v3109_v20, %v4654_v14  ;;  %v3111_v51 = vpop.eup %3110 }
 0x7da   : > { %3114 = vrcp.f32 %v2067_v37  ;;  %v2181_v58 = vmul.f32 %v3111_v51, %v4584_v38  ;;  %v2182_v11 = vmul.f32 %v3111_v51, %v4588_v48  ;;  %v3113_v16 = vpop.eup %3112 }
 0x7db   : > { %v2179_v19 = vmul.f32 %v3113_v16, %v4614_v62  ;;  %v2180_v61 = vmul.f32 %v3113_v16, %v4616_v24 }
 0x7dc   : > { %2258 = vmatpush.xpose.msrb.mxu2 %v2201_v59  ;;  %2281 = vmatpush.xpose.msrb.mxu3 %v2202_v8 }
 0x7e0   : > { %2259 = vmatpush.xpose.msrb.mxu2 %v2199_v28  ;;  %2282 = vmatpush.xpose.msrb.mxu3 %v2200_v55  ;;  %v3115_v59 = vpop.eup %3114  ;;  %v5052_v28 = vld [vmem:[#allocation40_spill] sm:$0xff] }
 0x7e1   : > { %v2177_v12 = vmul.f32 %v3115_v59, %v4664_v34  ;;  %v2178_v14 = vmul.f32 %v3115_v59, %v4666_v0  ;;  %v5050_v34 = vld [vmem:[#allocation21_spill] sm:$0xff]  ;;  %v5053_v55 = vld [vmem:[#allocation20_spill] sm:$0xff] }
 0x7e2   : > { %v1295_v0 = vadd.f32 %v5051_v47, %v5050_v34 }
 0x7e4   : > { %2260 = vmatpush.xpose.msrb.mxu2 %v2197_v26  ;;  %2283 = vmatpush.xpose.msrb.mxu3 %v2198_v39  ;;  %v236_v26 = vld [vmem:[#allocation2 + $0x18] sm:$0xff]  ;;  %v237_v39 = vld [vmem:[%s4829_s3] sm:$0xff] }
 0x7e5   : > { %2303 = vperm.xlu1 %2729, %v237_v39  }
 0x7e8   : > { %2261 = vmatpush.xpose.msrb.mxu2 %v2195_v10  ;;  %2284 = vmatpush.xpose.msrb.mxu3 %v2196_v52  ;;  %v238_v52 = vld [vmem:[%s4829_s3 + $0x8] sm:$0xff] }
 0x7e9   : > { %2308 = vperm.xlu2 %2730, %v238_v52  }
 0x7ec   : > { %2262 = vmatpush.xpose.msrb.mxu2 %v2193_v15  ;;  %2285 = vmatpush.xpose.msrb.mxu3 %v2194_v22  ;;  %v5055_v15 = vld [vmem:[#allocation41_spill] sm:$0xff] }
 0x7ed   : > { %v1341_v22 = vadd.f32 %v5055_v15, %v5054_v3 }
 0x7f0   : > { %2263 = vmatpush.xpose.msrb.mxu2 %v2191_v23  ;;  %2286 = vmatpush.xpose.msrb.mxu3 %v2192_v21  ;;  %v240_v23 = vld [vmem:[%s4829_s3 + $0x18] sm:$0xff] }
 0x7f1   : > { %2318 = vperm.xlu2 %2730, %v240_v23  }
 0x7f4   : > { %2264 = vmatpush.xpose.msrb.mxu2 %v2189_v42  ;;  %2287 = vmatpush.xpose.msrb.mxu3 %v2190_v33 }
 0x7f8   : > { %2265 = vmatpush.xpose.msrb.mxu2 %v2187_v29  ;;  %2288 = vmatpush.xpose.msrb.mxu3 %v2188_v54 }
 0x7fc   : > { %2266 = vmatpush.xpose.msrb.mxu2 %v2185_v9  ;;  %2289 = vmatpush.xpose.msrb.mxu3 %v2186_v46 }
 0x800   : > { %2267 = vmatpush.xpose.msrb.mxu2 %v2183_v5  ;;  %2290 = vmatpush.xpose.msrb.mxu3 %v2184_v13 }
 0x804   : > { %2268 = vmatpush.xpose.msrb.mxu2 %v2181_v58  ;;  %2291 = vmatpush.xpose.msrb.mxu3 %v2182_v11 }
 0x808   : > { %2269 = vmatpush.xpose.msrb.mxu2 %v2179_v19  ;;  %2292 = vmatpush.xpose.msrb.mxu3 %v2180_v61 }
 0x80c   : > { %2270 = vmatpush.xpose.msrb.mxu2 %v2177_v12  ;;  %2293 = vmatpush.xpose.msrb.mxu3 %v2178_v14 }
 0x80f   : > { %2271 = vmatmul.f32.vlgmr.msrb.gmra.mxu2 %v5030_v50  ;;  %2294 = vmatmul.f32.vlgmr.msrb.gmra.mxu3 %v5031_v18  ;;  %v1292_v50 = vadd.f32 %v5053_v55, %v5052_v28  ;;  %v233_v18 = vld [vmem:[#allocation2] sm:$0xff] }
 0x817   : > { %2274 = vmatmul.f32.gmra.mxu2 %v5036_v7  ;;  %2297 = vmatmul.f32.gmra.mxu3 %v5037_v41  ;;  %v234_v7 = vld [vmem:[#allocation2 + $0x8] sm:$0xff]  ;;  %v235_v41 = vld [vmem:[#allocation2 + $0x10] sm:$0xff] }
 0x83f   : > { %v2314_v49 = vpop.permute.xlu0 %2313 }
 0x843   : > { %v2309_v36 = vpop.permute.xlu2 %2308 }
 0x84b   : > { %v2319_v33 = vpop.permute.xlu2 %2318 }
 0x852   : > { %v2226_v38 = vpop.f32.mrf.mxu2  ;;  %v2249_v48 = vpop.f32.mrf.mxu3 }
 0x853   : > { %v2250_v8 = vadd.f32 %v2249_v48, %v2226_v38 }
 0x857   : > { %v2304_v21 = vpop.permute.xlu1 %2303 }
 0x85a   : > { %v2229_v62 = vpop.f32.mrf.mxu2  ;;  %v2252_v24 = vpop.f32.mrf.mxu3 }
 0x85b   : > { %v2253_v56 = vadd.f32 %v2252_v24, %v2229_v62 }
 0x85d   : > { %2345 = vmatpush.msra.mxu2 %v2253_v56 }
 0x85f   : > { %2346 = vmatpush.msra.mxu2 %v2250_v8 }
 0x861   : > { %2347 = vmatpush.msra.mxu2 %v1295_v0 }
 0x863   : > { %2348 = vmatpush.msra.mxu2 %v1292_v50 }
 0x864   : > { %2650 = vmatmul.msk.f32.vlgmr.msra.gmra.mxu2 %vm241_vm0, %v233_v18 }
 0x86c   : > { %2651 = vmatmul.msk.f32.gmra.mxu2 %vm241_vm0, %v234_v7 }
 0x874   : > { %2652 = vmatmul.msk.f32.gmra.mxu2 %vm241_vm0, %v235_v41 }
 0x87c   : > { %2653 = vmatmul.msk.f32.gmra.mxu2 %vm241_vm0, %v236_v26 }
 0x892   : > { %v2272_v17 = vpop.f32.mrf.mxu2  ;;  %v2295_v6 = vpop.f32.mrf.mxu3 }
 0x893   : > { %v2296_v40 = vadd.f32 %v2295_v6, %v2272_v17 }
 0x89a   : > { %v2275_v4 = vpop.f32.mrf.mxu2  ;;  %v2298_v63 = vpop.f32.mrf.mxu3 }
 0x89b   : > { %v2299_v10 = vadd.f32 %v2298_v63, %v2275_v4 }
 0x89d   : > { %2374 = vmatpush.msra.mxu3 %v2299_v10 }
 0x89f   : > { %2375 = vmatpush.msra.mxu3 %v2296_v40 }
 0x8a1   : > { %2376 = vmatpush.msra.mxu3 %v1341_v22 }
 0x8a3   : > { %2377 = vmatpush.msra.mxu3 %v1338_v44 }
 0x8a4   : > { %2654 = vmatmul.msk.f32.vlgmr.msra.gmra.mxu3 %vm241_vm0, %v233_v18 }
 0x8ac   : > { %2655 = vmatmul.msk.f32.gmra.mxu3 %vm241_vm0, %v234_v7 }
 0x8b4   : > { %2656 = vmatmul.msk.f32.gmra.mxu3 %vm241_vm0, %v235_v41 }
 0x8bc   : > { %2657 = vmatmul.msk.f32.gmra.mxu3 %vm241_vm0, %v236_v26 }
 0x8e7   : > { %v2350_v45 = vpop.f32.mrf.mxu2 }
 0x8e8   : > { %v2351_v32 = vadd.f32 %v2350_v45, %v2304_v21 }
 0x8ea   : > { %2391 = vst [vmem:[%s4782_s13] sm:$0xff] %v2351_v32 }
 0x8ef   : > { %v2353_v30 = vpop.f32.mrf.mxu2 }
 0x8f0   : > { %v2354_v42 = vadd.f32 %v2353_v30, %v2309_v36 }
 0x8f2   : > { %2393 = vst [vmem:[%s4782_s13 + $0x10] sm:$0xff] %v2354_v42 }
 0x8f7   : > { %v2356_v1 = vpop.f32.mrf.mxu2 }
 0x8f8   : > { %v2357_v31 = vadd.f32 %v2356_v1, %v2314_v49 }
 0x8fa   : > { %2395 = vst [vmem:[%s4782_s13 + $0x20] sm:$0xff] %v2357_v31 }
 0x8ff   : > { %v2359_v29 = vpop.f32.mrf.mxu2 }
 0x900   : > { %v2360_v54 = vadd.f32 %v2359_v29, %v2319_v33 }
 0x902   : > { %2397 = vst [vmem:[%s4782_s13 + $0x30] sm:$0xff] %v2360_v54 }
 0x927   : > { %v2379_v57 = vpop.f32.mrf.mxu3 }
 0x928   : > { %v2380_v2 = vadd.f32 %v2379_v57, %v2304_v21 }
 0x92a   : > { %2392 = vst [vmem:[%s4782_s13 + $0x8] sm:$0xff] %v2380_v2 }
 0x92f   : > { %v2382_v53 = vpop.f32.mrf.mxu3 }
 0x930   : > { %v2383_v9 = vadd.f32 %v2382_v53, %v2309_v36 }
 0x932   : > { %2394 = vst [vmem:[%s4782_s13 + $0x18] sm:$0xff] %v2383_v9 }
 0x937   : > { %v2385_v27 = vpop.f32.mrf.mxu3 }
 0x938   : > { %v2386_v46 = vadd.f32 %v2385_v27, %v2314_v49 }
 0x93a   : > { %2396 = vst [vmem:[%s4782_s13 + $0x28] sm:$0xff] %v2386_v46 }
 0x93f   : > { %v2388_v20 = vpop.f32.mrf.mxu3 }
 0x940   : > { %v2389_v37 = vadd.f32 %v2388_v20, %v2319_v33 }
 0x942   : > { %2398 = vst [vmem:[%s4782_s13 + $0x38] sm:$0xff] %v2389_v37 }
 0x943   : > { %3173 = shalt.err (!%p3170_p8)
}
 0x944   : > { %s3218_s10 = smov 256   ;;  %s3219_s11 = smov 16  }
 0x945   : > { %2677 = dma.vmem_to_hbm [thread:$0]  (%p3283_p5), %s2413_s27, 1024, %s2415_s28, %s2400_s29, %s3218_s10, %s3218_s10, %s3219_s11  }
 0x946 PF: > { %p2689_p9 = scmp.ge.s32.totalorder %s3212_s18, 2  ;;  %s2429_s12 = sand.u32 1, %s3200_s15  }
 0x947   : > { %s2430_s13 = scalar_lea.sflag [#allocation4], %s2429_s12 }
 0x948   : > { %p2684_p10 = pnand %p2689_p9, %p3287_p6 }
 0x94a   : > { %p2685_p11 = pneg %p2684_p10 }
 0x94c   : > { %3195 = dma.done.wait (%p2685_p11), %s2430_s13, 1024  }
 0x94d   : > { %3197 = vsyncadd (%p2685_p11), %s2430_s13, 4294966272  ;;  %p15_p12 = scmp.ge.s32.totalorder %s3270_s21, 4   ;;  %s5058_s15 = smov %s3204_s16 }
 0x94e   : > { %s5059_s16 = smov %s3208_s17  ;;  %s5060_s17 = smov %s3281_s24 }
 0x94f   : > { %s5061_s18 = smov %s3270_s21  ;;  %17 = sbr.rel (!%p15_p12) target bundleno = 4 (0x4), region = 76 }
 0x954   :  { %2436 = vsyncpa [#allocation3], 1 }
 0x955   :  { %2438 = vsyncpa [#allocation3 + $0x1], 1 }
 0x956   :  { %2439 = vsyncpa [#allocation4], 1 }
 0x957   :  { %2441 = vsyncpa [#allocation4 + $0x1], 1 }

</bundles_post_ra>
